<compile_context>
chip_gen: v7x
topology: tpu7x:2x2x1
jax: 0.10.0
libtpu: 0.0.40
codegen_flags: <defaults>
</compile_context>

<pallas_src>
import functools
import re

import jax
import jax.numpy as jnp
from jax import lax
from jax.experimental import pallas as pl
from jax.experimental.pallas import tpu as pltpu


@functools.lru_cache(maxsize=None)
def _tpu_config():
    """Generation-aware (vmem_limit_bytes, per-step VMEM budget, max tile rows, fuse-default)."""
    gen = 0
    try:
        kind = jax.devices()[0].device_kind
        m = re.search(r"(\d+)", kind)
        if m:
            gen = int(m.group(1))
    except Exception:
        pass
    vmem_cap = None
    try:
        vmem_cap = int(pltpu.get_tpu_info().vmem_capacity_bytes)
    except Exception:
        vmem_cap = None
    if vmem_cap is None:
        # Unknown -> assume the smallest (v7x-class 64 MiB) so we never over-subscribe.
        vmem_cap = (128 << 20) if gen in (5, 6) else (64 << 20)
    if gen >= 7:
        vmem_cap = min(vmem_cap, 64 << 20)          # v7x: 64 MiB per TensorCore
    vmem_limit = min((vmem_cap * 3) // 4, 96 << 20)  # leave headroom for Mosaic scratch
    tile_budget = vmem_limit // 2
    max_rows = 32 if vmem_cap <= (64 << 20) else 64
    # 256-deep MXU (v6e/v7x) benefits from a single K=9*Cin matmul; v5e's 128-deep
    # MXU already fills at K=Cin and prefers the 9-matmul path (fewer lane concats).
    fuse_default = (gen != 5)
    return vmem_limit, tile_budget, max_rows, fuse_default


@functools.lru_cache(maxsize=None)
def _lane_concat_ok(cin):
    """Probe whether Mosaic lowers a 9-way lane-axis concat of `cin`-wide operands
    (needed for the fused K=9*Cin im2col matmul).  Falls back to 9 matmuls if not."""
    try:
        def k(x_ref, o_ref):
            v = x_ref[...]
            o_ref[...] = jnp.concatenate([v] * 9, axis=-1)

        out = pl.pallas_call(
            k, out_shape=jax.ShapeDtypeStruct((8, 16, 9 * cin), jnp.bfloat16)
        )(jnp.ones((8, 16, cin), jnp.bfloat16))
        jax.block_until_ready(out)
        return True
    except Exception:
        return False


def _pick_tile_rows(H8, W, cin, cout, prologue, has_extra, out_bytes, fuse,
                    max_rows, budget):
    """Largest row-tile (multiple of 8 dividing H8, capped) whose estimated per-step
    VMEM working set (double-buffered blocks + in-kernel temporaries) fits budget."""
    def est(th):
        rw = W + 2
        io = th * rw * cin * 2 + 2 * rw * cin * 2          # bf16 main + 2-row halo views
        io += th * W * max(cout, 1) * out_bytes            # output tile
        if has_extra:
            io += th * W * 4
        io *= 2                                            # double buffering
        tmp = (th + 2) * rw * cin * 2                      # window concat copy
        if prologue:
            tmp += (th + 2) * rw * cin * 4                 # f32 affine temp
        if cout > 1:
            k = 9 * cin if fuse else cin
            tmp += 2 * th * W * k * 2 + th * W * cout * 4  # im2col patch (+reshape) + f32 acc
        else:
            tmp += th * W * cin * 4                        # per-channel f32 accumulator
        return io + tmp

    cands = [d for d in range(8, min(H8, max_rows) + 1, 8) if H8 % d == 0]
    fits = [d for d in cands if est(d) <= budget]
    if fits:
        return max(fits)
    return min(cands) if cands else H8


# ----------------------------------------------------------------------------
# The Pallas conv kernel (covers every 3x3 / stride-1 / pad-1 conv in the module)
# ----------------------------------------------------------------------------
def conv3x3(x, w, b, *, residual=False, extra_add=None,
            bn_scale=None, bn_shift=None, leaky_slope=0.2,
            out_dtype=jnp.float32, emit_stats=False, max_tile_rows=None):
    """Fused 3x3 / stride-1 / pad-1 convolution.

    x         : (N, H, W, Cin), f32 or bf16 NHWC
    w         : (3, 3, Cin, Cout) f32 (HWIO)
    b         : (Cout,) f32
    residual  : add x to the conv output (ResNetBlock); requires Cin == Cout.
                The residual is taken from the interior of the main input block
                (no separate residual HBM stream).
    extra_add : optional lane-dense (N, H, W) f32 tensor added to a Cout==1 output
    bn_scale/bn_shift : per-channel affine (folded BatchNorm) applied, with
                LeakyReLU(leaky_slope), to x *before* the conv and residual add.
    out_dtype : output dtype (bf16 for chain activations, f32 for final maps)
    emit_stats: additionally emit per-tile sum / sum-of-squares of the conv output
                (for fusing the following BatchNorm's batch statistics).

    Returns (N, H, W, Cout), or lane-dense (N, H, W) when Cout == 1.
    With emit_stats, returns (out, stats) where stats is (N, nT*8, Cout) f32 with
    row 0 of each 8-row group holding the tile sum and row 1 the sum of squares.
    """
    N, H, W, cin = x.shape
    cout = w.shape[-1]
    out_1ch = (cout == 1)
    prologue = bn_scale is not None
    has_extra = extra_add is not None
    if residual:
        assert cin == cout, "self-residual requires Cin == Cout"
    if has_extra:
        assert out_1ch, "extra_add is only supported for Cout == 1"
    if emit_stats:
        assert not out_1ch

    vmem_limit, budget, max_rows, fuse_default = _tpu_config()
    if max_tile_rows is not None:
        max_rows = max_tile_rows
    fuse = (not out_1ch) and (cin % 8 == 0) and fuse_default and _lane_concat_ok(cin)

    H8 = ((H + 7) // 8) * 8
    out_bytes = jnp.dtype(out_dtype).itemsize
    TH = _pick_tile_rows(H8, W, cin, cout, prologue, has_extra, out_bytes, fuse,
                         max_rows, budget)
    nT = H8 // TH
    halo_step = TH // 2                          # 2-row halo blocks (TH is even)

    # +1 row/col conv padding in bf16 (halves inter-layer pad traffic vs f32);
    # bottom padded to H8+1 so the 2-row halo of the last tile stays in bounds.
    # TODO(synk): the pad copy itself could be removed with in-kernel border
    # masking / Element-overlapping blocks; kept as a cheap bf16 XLA pad for now.
    xp = jnp.pad(x.astype(jnp.bfloat16),
                 ((0, 0), (1, H8 + 1 - H), (1, 1), (0, 0)))

    if out_1ch:
        wk = w.reshape(3, 3, cin).astype(jnp.float32)
    elif fuse:
        wk = w.reshape(9 * cin, cout).astype(jnp.bfloat16)   # (dy*dx*cin, cout)
    else:
        wk = w.astype(jnp.bfloat16)
    b2 = b.reshape(1, cout).astype(jnp.float32)

    inputs = [xp, xp, wk, b2]
    in_specs = [
        # main view: TH padded rows starting at row t*TH
        pl.BlockSpec((1, TH, W + 2, cin), lambda n, t: (n, t, 0, 0)),
        # halo view: the 2 padded rows immediately below the main view
        # TODO(synk): on v5e consider pipeline_mode=pl.Buffered(3) on the main view
        # if DMA is still exposed after the larger tiles.
        pl.BlockSpec((1, 2, W + 2, cin),
                     lambda n, t: (n, (t + 1) * halo_step, 0, 0)),
        pl.BlockSpec(wk.shape, lambda n, t: (0,) * wk.ndim),
        pl.BlockSpec((1, cout), lambda n, t: (0, 0)),
    ]
    if prologue:
        inputs += [bn_scale.reshape(1, cin).astype(jnp.float32),
                   bn_shift.reshape(1, cin).astype(jnp.float32)]
        in_specs += [pl.BlockSpec((1, cin), lambda n, t: (0, 0)),
                     pl.BlockSpec((1, cin), lambda n, t: (0, 0))]
    if has_extra:
        ea = extra_add if H8 == H else jnp.pad(extra_add,
                                               ((0, 0), (0, H8 - H), (0, 0)))
        inputs.append(ea.astype(jnp.float32))
        in_specs.append(pl.BlockSpec((1, TH, W), lambda n, t: (n, t, 0)))

    if out_1ch:
        out_shapes = [jax.ShapeDtypeStruct((N, H8, W), out_dtype)]
        out_specs = [pl.BlockSpec((1, TH, W), lambda n, t: (n, t, 0))]
    else:
        out_shapes = [jax.ShapeDtypeStruct((N, H8, W, cout), out_dtype)]
        out_specs = [pl.BlockSpec((1, TH, W, cout), lambda n, t: (n, t, 0, 0))]
    if emit_stats:
        out_shapes.append(jax.ShapeDtypeStruct((N, nT * 8, cout), jnp.float32))
        out_specs.append(pl.BlockSpec((1, 8, cout), lambda n, t: (n, t, 0)))

    def kernel(*refs):
        xa_ref, xb_ref, w_ref, b_ref = refs[:4]
        i = 4
        sc_ref = sh_ref = ea_ref = None
        if prologue:
            sc_ref, sh_ref = refs[i], refs[i + 1]; i += 2
        if has_extra:
            ea_ref = refs[i]; i += 1
        o_ref = refs[i]; i += 1
        st_ref = refs[i] if emit_stats else None

        t = pl.program_id(1)
        # (TH+2, W+2, Cin) window: TH main rows + 2-row halo (non-minor concat).
        win = jnp.concatenate([xa_ref[0], xb_ref[0]], axis=0)

        res = None
        if prologue:
            # Fused BatchNorm affine + LeakyReLU on the conv input; keep the zero
            # padding ring at zero.  The activated interior doubles as the residual.
            wf = win.astype(jnp.float32) * sc_ref[...] + sh_ref[...]
            wf = jnp.where(wf >= 0, wf, leaky_slope * wf)
            gr = lax.broadcasted_iota(jnp.int32, (TH + 2, W + 2, 1), 0) + t * TH
            gc = lax.broadcasted_iota(jnp.int32, (TH + 2, W + 2, 1), 1)
            is_pad = (gr == 0) | (gr >= H + 1) | (gc == 0) | (gc == W + 1)
            wf = jnp.where(is_pad, 0.0, wf)
            if residual:
                res = wf[1:1 + TH, 1:1 + W, :]
            win = wf.astype(jnp.bfloat16)
        elif residual:
            # Residual == interior of the main block; no extra HBM stream.
            res = win[1:1 + TH, 1:1 + W, :].astype(jnp.float32)

        if out_1ch:
            # Per-tap VPU FMA into a per-channel accumulator, then a single
            # cross-lane reduction (1 XLU reduce instead of 9); lane-dense store.
            accc = jnp.zeros((TH, W, cin), jnp.float32)
            for dy in range(3):
                for dx in range(3):
                    sl = win[dy:dy + TH, dx:dx + W, :].astype(jnp.float32)
                    accc = accc + sl * w_ref[dy, dx]
            acc = jnp.sum(accc, axis=-1) + b_ref[...]
            if has_extra:
                acc = acc + ea_ref[0]
            o_ref[0] = acc.astype(out_dtype)
        else:
            if fuse:
                # All 9 taps in one K = 9*Cin im2col matmul (fills the 256-deep MXU).
                parts = [win[dy:dy + TH, dx:dx + W, :]
                         for dy in range(3) for dx in range(3)]
                patch = jnp.concatenate(parts, axis=-1).reshape(TH * W, 9 * cin)
                acc = jnp.dot(patch, w_ref[...],
                              preferred_element_type=jnp.float32)
            else:
                acc = jnp.zeros((TH * W, cout), jnp.float32)
                for dy in range(3):
                    for dx in range(3):
                        p = win[dy:dy + TH, dx:dx + W, :].reshape(TH * W, cin)
                        acc = acc + jnp.dot(p, w_ref[dy, dx],
                                            preferred_element_type=jnp.float32)
            acc = (acc + b_ref[...]).reshape(TH, W, cout)
            if residual:
                acc = acc + res
            o_ref[0] = acc.astype(out_dtype)

            if emit_stats:
                # Per-tile sum / sum-of-squares for the fused BatchNorm statistics;
                # rows >= H (8-row rounding pad) are masked out of the reduction.
                gr = lax.broadcasted_iota(jnp.int32, (TH, W, 1), 0) + t * TH
                av = jnp.where(gr < H, acc, 0.0).reshape(TH * W, cout)
                s = jnp.sum(av, axis=0, keepdims=True)          # (1, cout)
                ss = jnp.sum(av * av, axis=0, keepdims=True)    # (1, cout)
                row = lax.broadcasted_iota(jnp.int32, (8, cout), 0)
                st_ref[0] = jnp.where(row == 0, s,
                                      jnp.where(row == 1, ss, 0.0))

    outs = pl.pallas_call(
        kernel,
        out_shape=tuple(out_shapes) if emit_stats else out_shapes[0],
        grid=(N, nT),
        in_specs=in_specs,
        out_specs=tuple(out_specs) if emit_stats else out_specs[0],
        compiler_params=pltpu.CompilerParams(
            dimension_semantics=("parallel", "parallel"),
            vmem_limit_bytes=vmem_limit),
    )(*inputs)

    if emit_stats:
        out, stats = outs
    else:
        out, stats = outs, None
    if H8 != H:
        out = out[:, :H]
    return (out, stats) if emit_stats else out


# ----------------------------------------------------------------------------
# JAX glue
# ----------------------------------------------------------------------------
def _interp_matrix(out_s, in_s):
    """Bilinear interpolation matrix (out_s, in_s), PyTorch align_corners=False rule."""
    o = jnp.arange(out_s, dtype=jnp.float32)
    src = jnp.maximum((o + 0.5) * (in_s / out_s) - 0.5, 0.0)
    i0 = jnp.clip(jnp.floor(src).astype(jnp.int32), 0, in_s - 1)
    i1 = jnp.minimum(i0 + 1, in_s - 1)
    f = (src - i0.astype(jnp.float32))[:, None]
    cols = jnp.arange(in_s, dtype=jnp.int32)[None, :]
    m0 = (cols == i0[:, None]).astype(jnp.float32) * (1.0 - f)
    m1 = (cols == i1[:, None]).astype(jnp.float32) * f
    return m0 + m1


def upsample_bilinear_2d(x, H_out, W_out):
    """F.upsample(mode='bilinear', align_corners=False) on a lane-dense (N, H, W)
    map, implemented as two small interpolation matmuls (gather-free, MXU)."""
    N, H_in, W_in = x.shape
    Mh = _interp_matrix(H_out, H_in)                       # (H_out, H_in)
    Mw = _interp_matrix(W_out, W_in)                       # (W_out, W_in)
    rows = jnp.einsum('oh,nhw->now', Mh, x)                # (N, H_out, W_in)
    return jnp.einsum('now,vw->nov', rows, Mw)             # (N, H_out, W_out)


def invalidation_net_forward(params, left_tower, right_tower, input_img,
                             full_res_disparity):
    """Inputs NCHW (PyTorch convention); output NCHW (N, 1, H, W)."""
    to_nhwc = lambda a: jnp.transpose(a, (0, 2, 3, 1))
    lt = to_nhwc(left_tower).astype(jnp.bfloat16)
    rt = to_nhwc(right_tower).astype(jnp.bfloat16)
    img = input_img[:, 0].astype(jnp.float32)              # (N, H, W) lane-dense
    disp = full_res_disparity[:, 0].astype(jnp.float32)    # (N, H, W) lane-dense

    # torch.cat([left_tower, right_tower], dim=1)
    out = jnp.concatenate([lt, rt], axis=-1)                # (N, h, w, 64) bf16

    # 5 x ResNetBlock(64, 64): out = x + conv3x3(x); bf16 chain activations
    for cw, cb in params["res1"]:
        out = conv3x3(out, cw, cb, residual=True, out_dtype=jnp.bfloat16)

    # conv_end1: 64 -> 1, lane-dense (N, h, w) f32 output
    low_small = conv3x3(out, params["end1_w"], params["end1_b"])

    # pred = low_small * input_img.size()[-1] / low_small.size()[-1]
    pred = low_small * jnp.float32(img.shape[2]) / jnp.float32(low_small.shape[2])

    # F.upsample(..., mode='bilinear', align_corners=False) to full resolution
    low_res_inval = upsample_bilinear_2d(pred, img.shape[1], img.shape[2])

    # torch.cat([input_img, Low_Res_invalidation, full_res_disparity], dim=1)
    # TODO(synk): the 3-channel conv_begin input rides the lane axis at 3/128
    # utilization; splitting it into lane-dense planes costs more than it saves.
    x3 = jnp.stack([img, low_res_inval, disp], axis=-1)      # (N, H, W, 3)

    # conv_begin: conv3x3(3->32); BN batch statistics (training mode) are emitted
    # as per-tile partial sums by the kernel; BN affine + LeakyReLU(0.2) are
    # folded into the first residual_blocks2 conv below.
    y, stats = conv3x3(x3, params["begin_w"], params["begin_b"],
                       out_dtype=jnp.bfloat16, emit_stats=True)
    count = jnp.float32(y.shape[0] * y.shape[1] * y.shape[2])
    s = jnp.sum(stats[:, 0::8, :], axis=(0, 1))
    ss = jnp.sum(stats[:, 1::8, :], axis=(0, 1))
    mean = s / count
    var = jnp.maximum(ss / count - mean * mean, 0.0)          # biased, as BN normalizes
    scale = params["bn_gamma"] * lax.rsqrt(var + 1e-5)
    shift = params["bn_beta"] - mean * scale

    # 4 x ResNetBlock(32, 32); the first one fuses the BN affine + LeakyReLU(0.2)
    w0, b0 = params["res2"][0]
    z = conv3x3(y, w0, b0, residual=True, bn_scale=scale, bn_shift=shift,
                out_dtype=jnp.bfloat16)
    for cw, cb in params["res2"][1:]:
        z = conv3x3(z, cw, cb, residual=True, out_dtype=jnp.bfloat16)

    # conv_end2 (32 -> 1) with "+ Low_Res_invalidation" fused in, lane-dense out
    result = conv3x3(z, params["end2_w"], params["end2_b"],
                     extra_add=low_res_inval)                 # (N, H, W) f32

    return result[:, None, :, :]                              # NCHW (N, 1, H, W)


# ----------------------------------------------------------------------------
# Deterministic parameter init (synthetic; matches the module's parameter shapes)
# ----------------------------------------------------------------------------
def init_params(key):
    keys = iter(jax.random.split(key, 64))

    def conv_w(cin, cout, scale):
        return jax.random.normal(next(keys), (3, 3, cin, cout), jnp.float32) * scale

    def conv_b(cout, scale=0.01):
        return jax.random.normal(next(keys), (cout,), jnp.float32) * scale

    params = {}
    params["res1"] = [(conv_w(64, 64, 0.03), conv_b(64)) for _ in range(5)]
    params["end1_w"] = conv_w(64, 1, 0.05)
    params["end1_b"] = conv_b(1)
    params["begin_w"] = conv_w(3, 32, 0.1)
    params["begin_b"] = conv_b(32)
    params["bn_gamma"] = 1.0 + 0.05 * jax.random.normal(next(keys), (32,), jnp.float32)
    params["bn_beta"] = 0.05 * jax.random.normal(next(keys), (32,), jnp.float32)
    params["res2"] = [(conv_w(32, 32, 0.05), conv_b(32)) for _ in range(4)]
    params["end2_w"] = conv_w(32, 1, 0.05)
    params["end2_b"] = conv_b(1)
    return params


# ----------------------------------------------------------------------------
if __name__ == "__main__":
    key = jax.random.PRNGKey(0)
    kp, k1, k2, k3, k4, k5, k6, k7 = jax.random.split(key, 8)

    params = init_params(kp)

    # Small shapes consistent with the forward pass: towers are low-res 32-channel
    # features; img / disparity are full-res single-channel maps.
    N, h_lo, w_lo, H, W = 2, 16, 16, 48, 48
    left_tower = jax.random.normal(k1, (N, 32, h_lo, w_lo), jnp.float32)
    right_tower = jax.random.normal(k2, (N, 32, h_lo, w_lo), jnp.float32)
    input_img = jax.random.normal(k3, (N, 1, H, W), jnp.float32)
    full_res_disparity = jax.random.normal(k4, (N, 1, H, W), jnp.float32)

    # Warm the hardware / lowering probes outside of tracing.
    _tpu_config()
    for c in (64, 32):
        _lane_concat_ok(c)

    # Multi-tile (2-row halo + in-block residual) correctness check vs XLA reference.
    xc = jax.random.normal(k5, (1, 24, 24, 64), jnp.float32)
    wc = jax.random.normal(k6, (3, 3, 64, 64), jnp.float32) * 0.03
    bc = jax.random.normal(k7, (64,), jnp.float32) * 0.01
    got = conv3x3(xc, wc, bc, residual=True, max_tile_rows=8)
    xb = xc.astype(jnp.bfloat16).astype(jnp.float32)
    wb = wc.astype(jnp.bfloat16).astype(jnp.float32)
    ref = xb + lax.conv_general_dilated(
        xb, wb, (1, 1), "SAME",
        dimension_numbers=("NHWC", "HWIO", "NHWC")) + bc
    err = float(jnp.max(jnp.abs(got - ref)))
    assert err < 5e-2, err

    fwd = jax.jit(invalidation_net_forward)
    out = fwd(params, left_tower, right_tower, input_img, full_res_disparity)
    out = jax.block_until_ready(out)

    assert out.shape == (N, 1, H, W), out.shape
    assert bool(jnp.all(jnp.isfinite(out)))
    print("KERNEL_OK")
</pallas_src>

<mosaic_0001>
module attributes {stable_mosaic.version = 11 : i64} {
  func.func @k(%arg0: memref<8x16x64xbf16, #tpu.memory_space<vmem>>, %arg1: memref<8x16x576xbf16, #tpu.memory_space<vmem>>) attributes {dimension_semantics = [], scalar_prefetch = 0 : i64, scratch_operands = 0 : i64, tpu.core_type = #tpu.core_type<tc>} {
    %c0 = arith.constant 0 : index
    %c0_0 = arith.constant 0 : index
    %c0_1 = arith.constant 0 : index
    %0 = vector.load %arg0[%c0, %c0_0, %c0_1] : memref<8x16x64xbf16, #tpu.memory_space<vmem>>, vector<8x16x64xbf16>
    %1 = tpu.concatenate %0, %0, %0, %0, %0, %0, %0, %0, %0 in 2 : vector<8x16x64xbf16>, vector<8x16x64xbf16>, vector<8x16x64xbf16>, vector<8x16x64xbf16>, vector<8x16x64xbf16>, vector<8x16x64xbf16>, vector<8x16x64xbf16>, vector<8x16x64xbf16>, vector<8x16x64xbf16> -> vector<8x16x576xbf16>
    %c0_2 = arith.constant 0 : index
    %c0_3 = arith.constant 0 : index
    %c0_4 = arith.constant 0 : index
    %2 = vector.load %arg1[%c0_2, %c0_3, %c0_4] : memref<8x16x576xbf16, #tpu.memory_space<vmem>>, vector<8x16x576xbf16>
    tpu.vector_store %arg1[%c0_2, %c0_3, %c0_4], %1 {strides = array<i32>} : memref<8x16x576xbf16, #tpu.memory_space<vmem>>, vector<8x16x576xbf16>,
    return
  }
}

module attributes {stable_mosaic.version = 11 : i64} {
  func.func @k(%arg0: memref<8x16x32xbf16, #tpu.memory_space<vmem>>, %arg1: memref<8x16x288xbf16, #tpu.memory_space<vmem>>) attributes {dimension_semantics = [], scalar_prefetch = 0 : i64, scratch_operands = 0 : i64, tpu.core_type = #tpu.core_type<tc>} {
    %c0 = arith.constant 0 : index
    %c0_0 = arith.constant 0 : index
    %c0_1 = arith.constant 0 : index
    %0 = vector.load %arg0[%c0, %c0_0, %c0_1] : memref<8x16x32xbf16, #tpu.memory_space<vmem>>, vector<8x16x32xbf16>
    %1 = tpu.concatenate %0, %0, %0, %0, %0, %0, %0, %0, %0 in 2 : vector<8x16x32xbf16>, vector<8x16x32xbf16>, vector<8x16x32xbf16>, vector<8x16x32xbf16>, vector<8x16x32xbf16>, vector<8x16x32xbf16>, vector<8x16x32xbf16>, vector<8x16x32xbf16>, vector<8x16x32xbf16> -> vector<8x16x288xbf16>
    %c0_2 = arith.constant 0 : index
    %c0_3 = arith.constant 0 : index
    %c0_4 = arith.constant 0 : index
    %2 = vector.load %arg1[%c0_2, %c0_3, %c0_4] : memref<8x16x288xbf16, #tpu.memory_space<vmem>>, vector<8x16x288xbf16>
    tpu.vector_store %arg1[%c0_2, %c0_3, %c0_4], %1 {strides = array<i32>} : memref<8x16x288xbf16, #tpu.memory_space<vmem>>, vector<8x16x288xbf16>,
    return
  }
}

module attributes {stable_mosaic.version = 11 : i64} {
  func.func @kernel(%arg0: i32, %arg1: i32, %arg2: memref<1x8x26x64xbf16, #tpu.memory_space<vmem>>, %arg3: memref<1x2x26x64xbf16, #tpu.memory_space<vmem>>, %arg4: memref<3x3x64x64xbf16, #tpu.memory_space<vmem>>, %arg5: memref<1x64xf32, #tpu.memory_space<vmem>>, %arg6: memref<1x8x24x64xf32, #tpu.memory_space<vmem>>) attributes {dimension_semantics = [#tpu.dimension_semantics<parallel>, #tpu.dimension_semantics<parallel>], iteration_bounds = array<i64: 1, 3>, scalar_prefetch = 0 : i64, scratch_operands = 0 : i64, tpu.core_type = #tpu.core_type<tc>, window_params = [{transform_indices = @transform_0, window_bounds = array<i64: 1, 8, 26, 64>}, {transform_indices = @transform_1, window_bounds = array<i64: 1, 2, 26, 64>}, {pipeline_mode = #tpu.pipeline_mode<synchronous>, transform_indices = @transform_2, window_bounds = array<i64: 3, 3, 64, 64>}, {pipeline_mode = #tpu.pipeline_mode<synchronous>, transform_indices = @transform_3, window_bounds = array<i64: 1, 64>}, {transform_indices = @transform_4, window_bounds = array<i64: 1, 8, 24, 64>}]} {
    %c0 = arith.constant 0 : index
    %c0_0 = arith.constant 0 : index
    %c0_1 = arith.constant 0 : index
    %c0_2 = arith.constant 0 : index
    %0 = vector.load %arg2[%c0, %c0_0, %c0_1, %c0_2] : memref<1x8x26x64xbf16, #tpu.memory_space<vmem>>, vector<1x8x26x64xbf16>
    %1 = vector.shape_cast %0 : vector<1x8x26x64xbf16> to vector<8x26x64xbf16>
    %c0_3 = arith.constant 0 : index
    %c0_4 = arith.constant 0 : index
    %c0_5 = arith.constant 0 : index
    %c0_6 = arith.constant 0 : index
    %2 = vector.load %arg3[%c0_3, %c0_4, %c0_5, %c0_6] : memref<1x2x26x64xbf16, #tpu.memory_space<vmem>>, vector<1x2x26x64xbf16>
    %3 = vector.shape_cast %2 : vector<1x2x26x64xbf16> to vector<2x26x64xbf16>
    %4 = tpu.concatenate %1, %3 in 0 : vector<8x26x64xbf16>, vector<2x26x64xbf16> -> vector<10x26x64xbf16>
    %5 = vector.extract_strided_slice %4 {offsets = [1, 1, 0], sizes = [8, 24, 64], strides = [1, 1, 1]} : vector<10x26x64xbf16> to vector<8x24x64xbf16>
    %6 = arith.extf %5 : vector<8x24x64xbf16> to vector<8x24x64xf32>
    %cst = arith.constant 0.000000e+00 : f32
    %7 = vector.broadcast %cst : f32 to vector<192x64xf32>
    %8 = vector.extract_strided_slice %4 {offsets = [0, 0, 0], sizes = [8, 24, 64], strides = [1, 1, 1]} : vector<10x26x64xbf16> to vector<8x24x64xbf16>
    %9 = vector.shape_cast %8 : vector<8x24x64xbf16> to vector<192x64xbf16>
    %c0_7 = arith.constant 0 : index
    %c0_8 = arith.constant 0 : index
    %c0_9 = arith.constant 0 : index
    %c0_10 = arith.constant 0 : index
    %10 = vector.load %arg4[%c0_7, %c0_8, %c0_9, %c0_10] : memref<3x3x64x64xbf16, #tpu.memory_space<vmem>>, vector<1x1x64x64xbf16>
    %11 = vector.shape_cast %10 : vector<1x1x64x64xbf16> to vector<64x64xbf16>
    %cst_11 = arith.constant dense<0.000000e+00> : vector<192x64xf32>
    %12 = tpu.matmul %9, %11, %cst_11 {dimension_numbers = #tpu.dot_dimension_numbers<[1], [0], [0], [1], [0, 0, 1, 1], [], []>} : vector<192x64xbf16>, vector<64x64xbf16>, vector<192x64xf32> -> vector<192x64xf32>
    %13 = arith.addf %7, %12 : vector<192x64xf32>
    %14 = vector.extract_strided_slice %4 {offsets = [0, 1, 0], sizes = [8, 24, 64], strides = [1, 1, 1]} : vector<10x26x64xbf16> to vector<8x24x64xbf16>
    %15 = vector.shape_cast %14 : vector<8x24x64xbf16> to vector<192x64xbf16>
    %c0_12 = arith.constant 0 : index
    %c1 = arith.constant 1 : index
    %c0_13 = arith.constant 0 : index
    %c0_14 = arith.constant 0 : index
    %16 = vector.load %arg4[%c0_12, %c1, %c0_13, %c0_14] : memref<3x3x64x64xbf16, #tpu.memory_space<vmem>>, vector<1x1x64x64xbf16>
    %17 = vector.shape_cast %16 : vector<1x1x64x64xbf16> to vector<64x64xbf16>
    %cst_15 = arith.constant dense<0.000000e+00> : vector<192x64xf32>
    %18 = tpu.matmul %15, %17, %cst_15 {dimension_numbers = #tpu.dot_dimension_numbers<[1], [0], [0], [1], [0, 0, 1, 1], [], []>} : vector<192x64xbf16>, vector<64x64xbf16>, vector<192x64xf32> -> vector<192x64xf32>
    %19 = arith.addf %13, %18 : vector<192x64xf32>
    %20 = vector.extract_strided_slice %4 {offsets = [0, 2, 0], sizes = [8, 24, 64], strides = [1, 1, 1]} : vector<10x26x64xbf16> to vector<8x24x64xbf16>
    %21 = vector.shape_cast %20 : vector<8x24x64xbf16> to vector<192x64xbf16>
    %c0_16 = arith.constant 0 : index
    %c2 = arith.constant 2 : index
    %c0_17 = arith.constant 0 : index
    %c0_18 = arith.constant 0 : index
    %22 = vector.load %arg4[%c0_16, %c2, %c0_17, %c0_18] : memref<3x3x64x64xbf16, #tpu.memory_space<vmem>>, vector<1x1x64x64xbf16>
    %23 = vector.shape_cast %22 : vector<1x1x64x64xbf16> to vector<64x64xbf16>
    %cst_19 = arith.constant dense<0.000000e+00> : vector<192x64xf32>
    %24 = tpu.matmul %21, %23, %cst_19 {dimension_numbers = #tpu.dot_dimension_numbers<[1], [0], [0], [1], [0, 0, 1, 1], [], []>} : vector<192x64xbf16>, vector<64x64xbf16>, vector<192x64xf32> -> vector<192x64xf32>
    %25 = arith.addf %19, %24 : vector<192x64xf32>
    %26 = vector.extract_strided_slice %4 {offsets = [1, 0, 0], sizes = [8, 24, 64], strides = [1, 1, 1]} : vector<10x26x64xbf16> to vector<8x24x64xbf16>
    %27 = vector.shape_cast %26 : vector<8x24x64xbf16> to vector<192x64xbf16>
    %c1_20 = arith.constant 1 : index
    %c0_21 = arith.constant 0 : index
    %c0_22 = arith.constant 0 : index
    %c0_23 = arith.constant 0 : index
    %28 = vector.load %arg4[%c1_20, %c0_21, %c0_22, %c0_23] : memref<3x3x64x64xbf16, #tpu.memory_space<vmem>>, vector<1x1x64x64xbf16>
    %29 = vector.shape_cast %28 : vector<1x1x64x64xbf16> to vector<64x64xbf16>
    %cst_24 = arith.constant dense<0.000000e+00> : vector<192x64xf32>
    %30 = tpu.matmul %27, %29, %cst_24 {dimension_numbers = #tpu.dot_dimension_numbers<[1], [0], [0], [1], [0, 0, 1, 1], [], []>} : vector<192x64xbf16>, vector<64x64xbf16>, vector<192x64xf32> -> vector<192x64xf32>
    %31 = arith.addf %25, %30 : vector<192x64xf32>
    %32 = vector.extract_strided_slice %4 {offsets = [1, 1, 0], sizes = [8, 24, 64], strides = [1, 1, 1]} : vector<10x26x64xbf16> to vector<8x24x64xbf16>
    %33 = vector.shape_cast %32 : vector<8x24x64xbf16> to vector<192x64xbf16>
    %c1_25 = arith.constant 1 : index
    %c1_26 = arith.constant 1 : index
    %c0_27 = arith.constant 0 : index
    %c0_28 = arith.constant 0 : index
    %34 = vector.load %arg4[%c1_25, %c1_26, %c0_27, %c0_28] : memref<3x3x64x64xbf16, #tpu.memory_space<vmem>>, vector<1x1x64x64xbf16>
    %35 = vector.shape_cast %34 : vector<1x1x64x64xbf16> to vector<64x64xbf16>
    %cst_29 = arith.constant dense<0.000000e+00> : vector<192x64xf32>
    %36 = tpu.matmul %33, %35, %cst_29 {dimension_numbers = #tpu.dot_dimension_numbers<[1], [0], [0], [1], [0, 0, 1, 1], [], []>} : vector<192x64xbf16>, vector<64x64xbf16>, vector<192x64xf32> -> vector<192x64xf32>
    %37 = arith.addf %31, %36 : vector<192x64xf32>
    %38 = vector.extract_strided_slice %4 {offsets = [1, 2, 0], sizes = [8, 24, 64], strides = [1, 1, 1]} : vector<10x26x64xbf16> to vector<8x24x64xbf16>
    %39 = vector.shape_cast %38 : vector<8x24x64xbf16> to vector<192x64xbf16>
    %c1_30 = arith.constant 1 : index
    %c2_31 = arith.constant 2 : index
    %c0_32 = arith.constant 0 : index
    %c0_33 = arith.constant 0 : index
    %40 = vector.load %arg4[%c1_30, %c2_31, %c0_32, %c0_33] : memref<3x3x64x64xbf16, #tpu.memory_space<vmem>>, vector<1x1x64x64xbf16>
    %41 = vector.shape_cast %40 : vector<1x1x64x64xbf16> to vector<64x64xbf16>
    %cst_34 = arith.constant dense<0.000000e+00> : vector<192x64xf32>
    %42 = tpu.matmul %39, %41, %cst_34 {dimension_numbers = #tpu.dot_dimension_numbers<[1], [0], [0], [1], [0, 0, 1, 1], [], []>} : vector<192x64xbf16>, vector<64x64xbf16>, vector<192x64xf32> -> vector<192x64xf32>
    %43 = arith.addf %37, %42 : vector<192x64xf32>
    %44 = vector.extract_strided_slice %4 {offsets = [2, 0, 0], sizes = [8, 24, 64], strides = [1, 1, 1]} : vector<10x26x64xbf16> to vector<8x24x64xbf16>
    %45 = vector.shape_cast %44 : vector<8x24x64xbf16> to vector<192x64xbf16>
    %c2_35 = arith.constant 2 : index
    %c0_36 = arith.constant 0 : index
    %c0_37 = arith.constant 0 : index
    %c0_38 = arith.constant 0 : index
    %46 = vector.load %arg4[%c2_35, %c0_36, %c0_37, %c0_38] : memref<3x3x64x64xbf16, #tpu.memory_space<vmem>>, vector<1x1x64x64xbf16>
    %47 = vector.shape_cast %46 : vector<1x1x64x64xbf16> to vector<64x64xbf16>
    %cst_39 = arith.constant dense<0.000000e+00> : vector<192x64xf32>
    %48 = tpu.matmul %45, %47, %cst_39 {dimension_numbers = #tpu.dot_dimension_numbers<[1], [0], [0], [1], [0, 0, 1, 1], [], []>} : vector<192x64xbf16>, vector<64x64xbf16>, vector<192x64xf32> -> vector<192x64xf32>
    %49 = arith.addf %43, %48 : vector<192x64xf32>
    %50 = vector.extract_strided_slice %4 {offsets = [2, 1, 0], sizes = [8, 24, 64], strides = [1, 1, 1]} : vector<10x26x64xbf16> to vector<8x24x64xbf16>
    %51 = vector.shape_cast %50 : vector<8x24x64xbf16> to vector<192x64xbf16>
    %c2_40 = arith.constant 2 : index
    %c1_41 = arith.constant 1 : index
    %c0_42 = arith.constant 0 : index
    %c0_43 = arith.constant 0 : index
    %52 = vector.load %arg4[%c2_40, %c1_41, %c0_42, %c0_43] : memref<3x3x64x64xbf16, #tpu.memory_space<vmem>>, vector<1x1x64x64xbf16>
    %53 = vector.shape_cast %52 : vector<1x1x64x64xbf16> to vector<64x64xbf16>
    %cst_44 = arith.constant dense<0.000000e+00> : vector<192x64xf32>
    %54 = tpu.matmul %51, %53, %cst_44 {dimension_numbers = #tpu.dot_dimension_numbers<[1], [0], [0], [1], [0, 0, 1, 1], [], []>} : vector<192x64xbf16>, vector<64x64xbf16>, vector<192x64xf32> -> vector<192x64xf32>
    %55 = arith.addf %49, %54 : vector<192x64xf32>
    %56 = vector.extract_strided_slice %4 {offsets = [2, 2, 0], sizes = [8, 24, 64], strides = [1, 1, 1]} : vector<10x26x64xbf16> to vector<8x24x64xbf16>
    %57 = vector.shape_cast %56 : vector<8x24x64xbf16> to vector<192x64xbf16>
    %c2_45 = arith.constant 2 : index
    %c2_46 = arith.constant 2 : index
    %c0_47 = arith.constant 0 : index
    %c0_48 = arith.constant 0 : index
    %58 = vector.load %arg4[%c2_45, %c2_46, %c0_47, %c0_48] : memref<3x3x64x64xbf16, #tpu.memory_space<vmem>>, vector<1x1x64x64xbf16>
    %59 = vector.shape_cast %58 : vector<1x1x64x64xbf16> to vector<64x64xbf16>
    %cst_49 = arith.constant dense<0.000000e+00> : vector<192x64xf32>
    %60 = tpu.matmul %57, %59, %cst_49 {dimension_numbers = #tpu.dot_dimension_numbers<[1], [0], [0], [1], [0, 0, 1, 1], [], []>} : vector<192x64xbf16>, vector<64x64xbf16>, vector<192x64xf32> -> vector<192x64xf32>
    %61 = arith.addf %55, %60 : vector<192x64xf32>
    %c0_50 = arith.constant 0 : index
    %c0_51 = arith.constant 0 : index
    %62 = vector.load %arg5[%c0_50, %c0_51] : memref<1x64xf32, #tpu.memory_space<vmem>>, vector<1x64xf32>
    %63 = vector.broadcast %62 : vector<1x64xf32> to vector<192x64xf32>
    %64 = arith.addf %61, %63 : vector<192x64xf32>
    %65 = vector.shape_cast %64 : vector<192x64xf32> to vector<8x24x64xf32>
    %66 = arith.addf %65, %6 : vector<8x24x64xf32>
    %c0_52 = arith.constant 0 : index
    %c0_53 = arith.constant 0 : index
    %c0_54 = arith.constant 0 : index
    %c0_55 = arith.constant 0 : index
    %67 = vector.load %arg6[%c0_52, %c0_53, %c0_54, %c0_55] : memref<1x8x24x64xf32, #tpu.memory_space<vmem>>, vector<1x8x24x64xf32>
    %68 = vector.shape_cast %67 : vector<1x8x24x64xf32> to vector<8x24x64xf32>
    %69 = vector.shape_cast %66 : vector<8x24x64xf32> to vector<1x8x24x64xf32>
    tpu.vector_store %arg6[%c0_52, %c0_53, %c0_54, %c0_55], %69 {strides = array<i32>} : memref<1x8x24x64xf32, #tpu.memory_space<vmem>>, vector<1x8x24x64xf32>,
    return
  }
  func.func @transform_0(%arg0: i32, %arg1: i32) -> (i32, i32, i32, i32) {
    %c0_i32 = arith.constant 0 : i32
    %c0_i32_0 = arith.constant 0 : i32
    %c0_i32_1 = arith.constant 0 : i32
    return %arg0, %arg1, %c0_i32, %c0_i32_0 : i32, i32, i32, i32
  }
  func.func @transform_1(%arg0: i32, %arg1: i32) -> (i32, i32, i32, i32) {
    %c1_i32 = arith.constant 1 : i32
    %0 = arith.addi %arg1, %c1_i32 : i32
    %c4_i32 = arith.constant 4 : i32
    %1 = arith.muli %0, %c4_i32 : i32
    %c0_i32 = arith.constant 0 : i32
    %c0_i32_0 = arith.constant 0 : i32
    %c0_i32_1 = arith.constant 0 : i32
    return %arg0, %1, %c0_i32, %c0_i32_0 : i32, i32, i32, i32
  }
  func.func @transform_2(%arg0: i32, %arg1: i32) -> (i32, i32, i32, i32) {
    %c0_i32 = arith.constant 0 : i32
    %c0_i32_0 = arith.constant 0 : i32
    %c0_i32_1 = arith.constant 0 : i32
    %c0_i32_2 = arith.constant 0 : i32
    %c0_i32_3 = arith.constant 0 : i32
    return %c0_i32, %c0_i32_0, %c0_i32_1, %c0_i32_2 : i32, i32, i32, i32
  }
  func.func @transform_3(%arg0: i32, %arg1: i32) -> (i32, i32) {
    %c0_i32 = arith.constant 0 : i32
    %c0_i32_0 = arith.constant 0 : i32
    %c0_i32_1 = arith.constant 0 : i32
    return %c0_i32, %c0_i32_0 : i32, i32
  }
  func.func @transform_4(%arg0: i32, %arg1: i32) -> (i32, i32, i32, i32) {
    %c0_i32 = arith.constant 0 : i32
    %c0_i32_0 = arith.constant 0 : i32
    %c0_i32_1 = arith.constant 0 : i32
    return %arg0, %arg1, %c0_i32, %c0_i32_0 : i32, i32, i32, i32
  }
}

</mosaic_0001>

<bundles_post_ra>
// kernel: tpu_custom_call.1
= control target key start
LH: loop header
LB: loop body
LE: loop exit
PB: predicated region body
PF: predicated region fallthrough
CT: control target
= control target key end

     0   :  { %6 = vsyncpa [#allocation3], 0  ;;  %s474_s0 = inlined_call_operand.hbm [shape: bf16[8,16,64], index: 0, kind: input, shape index: {}]   ;;  %s475_s1 = inlined_call_operand.hbm [shape: bf16[8,16,576], index: 1, kind: output, shape index: {}]  }
   0x1   :  { %7 = vsyncpa [#allocation4], 0  ;;  %s392_s6 = smov [#allocation2]   ;;  %s344_s10 = scalar_lea.hbm %s474_s0, 1024 }
   0x2   :  { %s13_s7 = sshll.u32 %s392_s6, 4  ;;  %p345_p0 = scmp.ne.s32.totalorder %s474_s0, %s344_s10  ;;  %s14_s7 = int_to_ptr.vmem [resolvable:$true] %s13_s7 }
   0x3   :  { %p348_p1 = scmp.lt.u32.totalorder %s344_s10, %s474_s0 }
   0x5   :  { %p350_p2 = pnand %p348_p1, %p345_p0 }
   0x7   :  { %353 = shalt.err (!%p350_p2)
}
   0x8   :  { %s354_s15 = scalar_lea.vmem %s14_s7, 1024  ;;  %p359_p4 = scmp.lt.s32.totalorder %s14_s7, %s14_s7 }
   0x9   :  { %p355_p3 = scmp.ne.s32.totalorder %s14_s7, %s354_s15  ;;  %p360_p5 = scmp.lt.s32.totalorder %s354_s15, %s354_s15 }
   0xb   :  { %p361_p6 = por %p360_p5, %p359_p4 }
   0xd   :  { %p362_p7 = pnand %p361_p6, %p355_p3 }
   0xf   :  { %365 = shalt.err (!%p362_p7)
}
  0x10   :  { %s393_s16 = smov 64   ;;  %s394_s17 = smov 4  }
  0x11   :  { %19 = dma.hbm_to_vmem [thread:$0]  %s474_s0, 1024, %s14_s7, [#allocation3], %s393_s16, %s393_s16, %s394_s17  }
  0x12   :  { %388 = dma.done.wait [#allocation3], 1024  }
  0x13   :  { %389 = vsyncadd [#allocation3], 4294966272  ;;  %vm210_vm0 = vcmask 519168   ;;  %v27_v0 = vld [vmem:[#allocation2 + $0x10] sm:$0xf]  ;;  %vm95_vm1 = vcmask 523264  }
  0x14   :  { %v28_v1 = vld [vmem:[#allocation2 + $0x14] sm:$0xf]  ;;  %v23_v2 = vld [vmem:[#allocation2] sm:$0xf]  ;;  %v291_v4 = vcombine.low %v27_v0, %v27_v0  ;;  %v24_v6 = vld [vmem:[#allocation2 + $0x4] sm:$0xf] }
  0x15   :  { %v422_v3 = vcombine.low %v27_v0, %v28_v1  ;;  %v293_v5 = vcombine.low %v28_v1, %v28_v1  ;;  %v283_v7 = vcombine.low %v23_v2, %v23_v2  ;;  %v29_v8 = vld [vmem:[#allocation2 + $0x18] sm:$0xf]  ;;  %v30_v9 = vld [vmem:[#allocation2 + $0x1c] sm:$0xf]  ;;  %v274_v10 = vcombine.low %v23_v2, %v24_v6  ;;  %v25_v13 = vld [vmem:[#allocation2 + $0x8] sm:$0xf] }
  0x16   :  { %v285_v11 = vcombine.low %v24_v6, %v24_v6  ;;  %v295_v12 = vcombine.low %v29_v8, %v29_v8  ;;  %v26_v14 = vld [vmem:[#allocation2 + $0xc] sm:$0xf]  ;;  %223 = vst.msk [vmem:[#allocation5 + $0x60] sm:$0xf] %vm210_vm0, %v291_v4  ;;  %v429_v15 = vcombine.low %v29_v8, %v30_v9  ;;  %v297_v16 = vcombine.low %v30_v9, %v30_v9  ;;  %v33_v19 = vld [vmem:[#allocation2 + $0x28] sm:$0xf] }
  0x17   :  { %226 = vst.msk [vmem:[#allocation5 + $0x74] sm:$0xf] %vm210_vm0, %v293_v5  ;;  %83 = vrot.lane.b32.xlu1 %v422_v3, %s393_s16  ;;  %211 = vst.msk [vmem:[#allocation5 + $0x10] sm:$0xf] %vm210_vm0, %v283_v7  ;;  %v287_v17 = vcombine.low %v25_v13, %v25_v13  ;;  %v289_v18 = vcombine.low %v26_v14, %v26_v14  ;;  %v34_v20 = vld [vmem:[#allocation2 + $0x2c] sm:$0xf]  ;;  %79 = vrot.lane.b32.xlu0 %v274_v10, %s393_s16 }
  0x18   :  { %214 = vst.msk [vmem:[#allocation5 + $0x24] sm:$0xf] %vm210_vm0, %v285_v11  ;;  %229 = vst.msk [vmem:[#allocation5 + $0x88] sm:$0xf] %vm210_vm0, %v295_v12  ;;  %v275_v21 = vcombine.low %v25_v13, %v26_v14  ;;  %v303_v22 = vcombine.low %v33_v19, %v33_v19  ;;  %v305_v23 = vcombine.low %v34_v20, %v34_v20  ;;  %v31_v24 = vld [vmem:[#allocation2 + $0x20] sm:$0xf] }
  0x19   :  { %v32_v25 = vld [vmem:[#allocation2 + $0x24] sm:$0xf]  ;;  %v37_v26 = vld [vmem:[#allocation2 + $0x38] sm:$0xf]  ;;  %232 = vst.msk [vmem:[#allocation5 + $0x9c] sm:$0xf] %vm210_vm0, %v297_v16  ;;  %v299_v27 = vcombine.low %v31_v24, %v31_v24  ;;  %v279_v36 = vcombine.low %v33_v19, %v34_v20 }
  0x1a   :  { %217 = vst.msk [vmem:[#allocation5 + $0x38] sm:$0xf] %vm210_vm0, %v287_v17  ;;  %220 = vst.msk [vmem:[#allocation5 + $0x4c] sm:$0xf] %vm210_vm0, %v289_v18  ;;  %v301_v28 = vcombine.low %v32_v25, %v32_v25  ;;  %v38_v29 = vld [vmem:[#allocation2 + $0x3c] sm:$0xf]  ;;  %v311_v30 = vcombine.low %v37_v26, %v37_v26  ;;  %v278_v37 = vcombine.low %v31_v24, %v32_v25 }
  0x1b   :  { %v35_v31 = vld [vmem:[#allocation2 + $0x30] sm:$0xf]  ;;  %v36_v32 = vld [vmem:[#allocation2 + $0x34] sm:$0xf]  ;;  %241 = vst.msk [vmem:[#allocation5 + $0xd8] sm:$0xf] %vm210_vm0, %v303_v22  ;;  %v313_v33 = vcombine.low %v38_v29, %v38_v29  ;;  %85 = vrot.lane.b32.xlu1 %v429_v15, %s393_s16  ;;  %81 = vrot.lane.b32.xlu0 %v275_v21, %s393_s16  ;;  %v281_v38 = vcombine.low %v37_v26, %v38_v29 }
  0x1c   :  { %244 = vst.msk [vmem:[#allocation5 + $0xec] sm:$0xf] %vm210_vm0, %v305_v23  ;;  %v307_v34 = vcombine.low %v35_v31, %v35_v31  ;;  %v309_v35 = vcombine.low %v36_v32, %v36_v32  ;;  %235 = vst.msk [vmem:[#allocation5 + $0xb0] sm:$0xf] %vm210_vm0, %v299_v27  ;;  %v280_v39 = vcombine.low %v35_v31, %v36_v32  ;;  %s395_s0 = smov [#allocation5]  }
  0x1d   :  { %238 = vst.msk [vmem:[#allocation5 + $0xc4] sm:$0xf] %vm210_vm0, %v301_v28  ;;  %253 = vst.msk [vmem:[#allocation5 + $0x128] sm:$0xf] %vm210_vm0, %v311_v30  ;;  %s262_s20 = sshll.u32 %s395_s0, 4  ;;  %s263_s20 = int_to_ptr.vmem [resolvable:$true] %s262_s20 }
  0x1e   :  { %256 = vst.msk [vmem:[#allocation5 + $0x13c] sm:$0xf] %vm210_vm0, %v313_v33  ;;  %247 = vst.msk [vmem:[#allocation5 + $0x100] sm:$0xf] %vm210_vm0, %v307_v34  ;;  %s366_s21 = scalar_lea.vmem %s263_s20, 5120  ;;  %p371_p9 = scmp.lt.s32.totalorder %s263_s20, %s263_s20 }
  0x1f   :  { %250 = vst.msk [vmem:[#allocation5 + $0x114] sm:$0xf] %vm210_vm0, %v309_v35  ;;  %89 = vrot.lane.b32.xlu1 %v279_v36, %s393_s16  ;;  %87 = vrot.lane.b32.xlu0 %v278_v37, %s393_s16  ;;  %p367_p8 = scmp.ne.s32.totalorder %s263_s20, %s366_s21  ;;  %p372_p10 = scmp.lt.s32.totalorder %s366_s21, %s366_s21 }
  0x21   :  { %p373_p11 = por %p372_p10, %p371_p9 }
  0x23   :  { %93 = vrot.lane.b32.xlu1 %v281_v38, %s393_s16  ;;  %91 = vrot.lane.b32.xlu0 %v280_v39, %s393_s16  ;;  %p374_p12 = pnand %p373_p11, %p367_p8 }
  0x89   :  { %v84_v40 = vpop.permute.xlu1 %83  ;;  %v80_v42 = vpop.permute.xlu0 %79 }
  0x8a   :  { %v104_v41 = vsel %vm95_vm1, %v422_v3, %v84_v40  ;;  %v98_v45 = vsel %vm95_vm1, %v274_v10, %v80_v42 }
  0x8b   :  { %v290_v43 = vcombine.low %v104_v41, %v104_v41  ;;  %v292_v44 = vcombine.high %v104_v41, %v104_v41  ;;  %v282_v46 = vcombine.low %v98_v45, %v98_v45  ;;  %v284_v47 = vcombine.high %v98_v45, %v98_v45 }
  0x8d   :  { %221 = vst [vmem:[#allocation5 + $0x50] sm:$0xff] %v290_v43  ;;  %222 = vst [vmem:[#allocation5 + $0x58] sm:$0xff] %v290_v43  ;;  %v86_v48 = vpop.permute.xlu1 %85  ;;  %v82_v50 = vpop.permute.xlu0 %81 }
  0x8e   :  { %224 = vst [vmem:[#allocation5 + $0x64] sm:$0xff] %v292_v44  ;;  %225 = vst [vmem:[#allocation5 + $0x6c] sm:$0xff] %v292_v44  ;;  %v107_v49 = vsel %vm95_vm1, %v429_v15, %v86_v48  ;;  %v101_v53 = vsel %vm95_vm1, %v275_v21, %v82_v50 }
  0x8f   :  { %208 = vst [vmem:[#allocation5] sm:$0xff] %v282_v46  ;;  %209 = vst [vmem:[#allocation5 + $0x8] sm:$0xff] %v282_v46  ;;  %v294_v51 = vcombine.low %v107_v49, %v107_v49  ;;  %v296_v52 = vcombine.high %v107_v49, %v107_v49  ;;  %v286_v54 = vcombine.low %v101_v53, %v101_v53 }
  0x90   :  { %212 = vst [vmem:[#allocation5 + $0x14] sm:$0xff] %v284_v47  ;;  %213 = vst [vmem:[#allocation5 + $0x1c] sm:$0xff] %v284_v47  ;;  %v288_v55 = vcombine.high %v101_v53, %v101_v53 }
  0x91   :  { %227 = vst [vmem:[#allocation5 + $0x78] sm:$0xff] %v294_v51  ;;  %228 = vst [vmem:[#allocation5 + $0x80] sm:$0xff] %v294_v51  ;;  %v90_v56 = vpop.permute.xlu1 %89  ;;  %v88_v58 = vpop.permute.xlu0 %87 }
  0x92   :  { %230 = vst [vmem:[#allocation5 + $0x8c] sm:$0xff] %v296_v52  ;;  %231 = vst [vmem:[#allocation5 + $0x94] sm:$0xff] %v296_v52  ;;  %v113_v57 = vsel %vm95_vm1, %v279_v36, %v90_v56  ;;  %v110_v61 = vsel %vm95_vm1, %v278_v37, %v88_v58 }
  0x93   :  { %215 = vst [vmem:[#allocation5 + $0x28] sm:$0xff] %v286_v54  ;;  %216 = vst [vmem:[#allocation5 + $0x30] sm:$0xff] %v286_v54  ;;  %v302_v59 = vcombine.low %v113_v57, %v113_v57  ;;  %v304_v60 = vcombine.high %v113_v57, %v113_v57  ;;  %v298_v62 = vcombine.low %v110_v61, %v110_v61 }
  0x94   :  { %218 = vst [vmem:[#allocation5 + $0x3c] sm:$0xff] %v288_v55  ;;  %219 = vst [vmem:[#allocation5 + $0x44] sm:$0xff] %v288_v55  ;;  %v300_v63 = vcombine.high %v110_v61, %v110_v61 }
  0x95   :  { %239 = vst [vmem:[#allocation5 + $0xc8] sm:$0xff] %v302_v59  ;;  %240 = vst [vmem:[#allocation5 + $0xd0] sm:$0xff] %v302_v59  ;;  %v94_v0 = vpop.permute.xlu1 %93  ;;  %v92_v2 = vpop.permute.xlu0 %91 }
  0x96   :  { %242 = vst [vmem:[#allocation5 + $0xdc] sm:$0xff] %v304_v60  ;;  %243 = vst [vmem:[#allocation5 + $0xe4] sm:$0xff] %v304_v60  ;;  %v119_v1 = vsel %vm95_vm1, %v281_v38, %v94_v0  ;;  %v116_v5 = vsel %vm95_vm1, %v280_v39, %v92_v2 }
  0x97   :  { %233 = vst [vmem:[#allocation5 + $0xa0] sm:$0xff] %v298_v62  ;;  %234 = vst [vmem:[#allocation5 + $0xa8] sm:$0xff] %v298_v62  ;;  %v310_v3 = vcombine.low %v119_v1, %v119_v1  ;;  %v312_v4 = vcombine.high %v119_v1, %v119_v1  ;;  %v306_v6 = vcombine.low %v116_v5, %v116_v5 }
  0x98   :  { %236 = vst [vmem:[#allocation5 + $0xb4] sm:$0xff] %v300_v63  ;;  %237 = vst [vmem:[#allocation5 + $0xbc] sm:$0xff] %v300_v63  ;;  %v308_v7 = vcombine.high %v116_v5, %v116_v5 }
  0x99   :  { %251 = vst [vmem:[#allocation5 + $0x118] sm:$0xff] %v310_v3  ;;  %252 = vst [vmem:[#allocation5 + $0x120] sm:$0xff] %v310_v3 }
  0x9a   :  { %254 = vst [vmem:[#allocation5 + $0x12c] sm:$0xff] %v312_v4  ;;  %255 = vst [vmem:[#allocation5 + $0x134] sm:$0xff] %v312_v4 }
  0x9b   :  { %245 = vst [vmem:[#allocation5 + $0xf0] sm:$0xff] %v306_v6  ;;  %246 = vst [vmem:[#allocation5 + $0xf8] sm:$0xff] %v306_v6 }
  0x9c   :  { %248 = vst [vmem:[#allocation5 + $0x104] sm:$0xff] %v308_v7  ;;  %249 = vst [vmem:[#allocation5 + $0x10c] sm:$0xff] %v308_v7 }
  0x9d   :  { %377 = shalt.err (!%p374_p12)
}
  0x9e   :  { %s378_s24 = scalar_lea.hbm %s475_s1, 5120 }
  0x9f   :  { %p379_p13 = scmp.ne.s32.totalorder %s475_s1, %s378_s24  ;;  %p382_p0 = scmp.lt.u32.totalorder %s378_s24, %s475_s1 }
  0xa1   :  { %p384_p1 = pnand %p382_p0, %p379_p13 }
  0xa3   :  { %387 = shalt.err (!%p384_p1)
}
  0xa4   :  { %s396_s29 = smov 320   ;;  %s397_s30 = smov 20  }
  0xa5   :  { %268 = dma.vmem_to_hbm [thread:$0]  %s263_s20, 5120, %s475_s1, [#allocation4], %s396_s29, %s396_s29, %s397_s30  }
  0xa6   :  { %390 = dma.done.wait [#allocation4], 5120  }
  0xa7   :  { %391 = vsyncadd [#allocation4], 4294962176 }
  0xa8   :  { %272 = vsyncpa [#allocation3], 1 }
  0xa9   :  { %273 = vsyncpa [#allocation4], 1 }

// kernel: tpu_custom_call.1
= control target key start
LH: loop header
LB: loop body
LE: loop exit
PB: predicated region body
PF: predicated region fallthrough
CT: control target
= control target key end

     0   :  { %6 = vsyncpa [#allocation3], 0  ;;  %s592_s0 = inlined_call_operand.hbm [shape: bf16[8,16,32], index: 0, kind: input, shape index: {}]   ;;  %s593_s1 = inlined_call_operand.hbm [shape: bf16[8,16,288], index: 1, kind: output, shape index: {}]  }
   0x1   :  { %7 = vsyncpa [#allocation4], 0  ;;  %s444_s6 = smov [#allocation2]   ;;  %s396_s10 = scalar_lea.hbm %s592_s0, 1024 }
   0x2   :  { %s13_s7 = sshll.u32 %s444_s6, 4  ;;  %p397_p0 = scmp.ne.s32.totalorder %s592_s0, %s396_s10  ;;  %s14_s7 = int_to_ptr.vmem [resolvable:$true] %s13_s7 }
   0x3   :  { %p400_p1 = scmp.lt.u32.totalorder %s396_s10, %s592_s0 }
   0x5   :  { %p402_p2 = pnand %p400_p1, %p397_p0 }
   0x7   :  { %405 = shalt.err (!%p402_p2)
}
   0x8   :  { %s406_s15 = scalar_lea.vmem %s14_s7, 1024  ;;  %p411_p4 = scmp.lt.s32.totalorder %s14_s7, %s14_s7 }
   0x9   :  { %p407_p3 = scmp.ne.s32.totalorder %s14_s7, %s406_s15  ;;  %p412_p5 = scmp.lt.s32.totalorder %s406_s15, %s406_s15 }
   0xb   :  { %p413_p6 = por %p412_p5, %p411_p4 }
   0xd   :  { %p414_p7 = pnand %p413_p6, %p407_p3 }
   0xf   :  { %417 = shalt.err (!%p414_p7)
}
  0x10   :  { %s445_s16 = smov 64   ;;  %s446_s17 = smov 4  }
  0x11   :  { %19 = dma.hbm_to_vmem [thread:$0]  %s592_s0, 1024, %s14_s7, [#allocation3], %s445_s16, %s445_s16, %s446_s17  }
  0x12   :  { %440 = dma.done.wait [#allocation3], 1024  }
  0x13   :  { %441 = vsyncadd [#allocation3], 4294966272  ;;  %vm275_vm0 = vcmask 257024   ;;  %v27_v0 = vld [vmem:[#allocation2 + $0x10] sm:$0xf]  ;;  %s447_s0 = smov 32  }
  0x14   :  { %v28_v1 = vld [vmem:[#allocation2 + $0x14] sm:$0xf]  ;;  %v23_v2 = vld [vmem:[#allocation2] sm:$0xf]  ;;  %v341_v4 = vcombine.low %v27_v0, %v27_v0  ;;  %v24_v6 = vld [vmem:[#allocation2 + $0x4] sm:$0xf] }
  0x15   :  { %v476_v3 = vcombine.low %v27_v0, %v28_v1  ;;  %v343_v5 = vcombine.low %v28_v1, %v28_v1  ;;  %v333_v7 = vcombine.low %v23_v2, %v23_v2  ;;  %v29_v8 = vld [vmem:[#allocation2 + $0x18] sm:$0xf]  ;;  %v30_v9 = vld [vmem:[#allocation2 + $0x1c] sm:$0xf]  ;;  %v478_v10 = vcombine.low %v23_v2, %v24_v6  ;;  %v25_v13 = vld [vmem:[#allocation2 + $0x8] sm:$0xf] }
  0x16   :  { %v335_v11 = vcombine.low %v24_v6, %v24_v6  ;;  %v345_v12 = vcombine.low %v29_v8, %v29_v8  ;;  %v26_v14 = vld [vmem:[#allocation2 + $0xc] sm:$0xf]  ;;  %284 = vst.msk [vmem:[#allocation5 + $0x38] sm:$0xf] %vm275_vm0, %v341_v4  ;;  %v485_v15 = vcombine.low %v29_v8, %v30_v9  ;;  %v347_v16 = vcombine.low %v30_v9, %v30_v9  ;;  %v33_v19 = vld [vmem:[#allocation2 + $0x28] sm:$0xf] }
  0x17   :  { %286 = vst.msk [vmem:[#allocation5 + $0x44] sm:$0xf] %vm275_vm0, %v343_v5  ;;  %83 = vrot.lane.b32.xlu1 %v476_v3, %s447_s0  ;;  %276 = vst.msk [vmem:[#allocation5 + $0x8] sm:$0xf] %vm275_vm0, %v333_v7  ;;  %v337_v17 = vcombine.low %v25_v13, %v25_v13  ;;  %v339_v18 = vcombine.low %v26_v14, %v26_v14  ;;  %v34_v20 = vld [vmem:[#allocation2 + $0x2c] sm:$0xf]  ;;  %79 = vrot.lane.b32.xlu0 %v478_v10, %s447_s0 }
  0x18   :  { %278 = vst.msk [vmem:[#allocation5 + $0x14] sm:$0xf] %vm275_vm0, %v335_v11  ;;  %288 = vst.msk [vmem:[#allocation5 + $0x50] sm:$0xf] %vm275_vm0, %v345_v12  ;;  %v491_v21 = vcombine.low %v25_v13, %v26_v14  ;;  %v353_v22 = vcombine.low %v33_v19, %v33_v19  ;;  %v355_v23 = vcombine.low %v34_v20, %v34_v20  ;;  %v31_v24 = vld [vmem:[#allocation2 + $0x20] sm:$0xf] }
  0x19   :  { %v32_v25 = vld [vmem:[#allocation2 + $0x24] sm:$0xf]  ;;  %v37_v26 = vld [vmem:[#allocation2 + $0x38] sm:$0xf]  ;;  %290 = vst.msk [vmem:[#allocation5 + $0x5c] sm:$0xf] %vm275_vm0, %v347_v16  ;;  %v349_v27 = vcombine.low %v31_v24, %v31_v24  ;;  %v500_v36 = vcombine.low %v33_v19, %v34_v20 }
  0x1a   :  { %280 = vst.msk [vmem:[#allocation5 + $0x20] sm:$0xf] %vm275_vm0, %v337_v17  ;;  %282 = vst.msk [vmem:[#allocation5 + $0x2c] sm:$0xf] %vm275_vm0, %v339_v18  ;;  %v351_v28 = vcombine.low %v32_v25, %v32_v25  ;;  %v38_v29 = vld [vmem:[#allocation2 + $0x3c] sm:$0xf]  ;;  %v361_v30 = vcombine.low %v37_v26, %v37_v26  ;;  %v507_v37 = vcombine.low %v31_v24, %v32_v25 }
  0x1b   :  { %v35_v31 = vld [vmem:[#allocation2 + $0x30] sm:$0xf]  ;;  %v36_v32 = vld [vmem:[#allocation2 + $0x34] sm:$0xf]  ;;  %296 = vst.msk [vmem:[#allocation5 + $0x80] sm:$0xf] %vm275_vm0, %v353_v22  ;;  %v363_v33 = vcombine.low %v38_v29, %v38_v29  ;;  %85 = vrot.lane.b32.xlu1 %v485_v15, %s447_s0  ;;  %81 = vrot.lane.b32.xlu0 %v491_v21, %s447_s0  ;;  %v514_v38 = vcombine.low %v37_v26, %v38_v29 }
  0x1c   :  { %298 = vst.msk [vmem:[#allocation5 + $0x8c] sm:$0xf] %vm275_vm0, %v355_v23  ;;  %v357_v34 = vcombine.low %v35_v31, %v35_v31  ;;  %v359_v35 = vcombine.low %v36_v32, %v36_v32  ;;  %292 = vst.msk [vmem:[#allocation5 + $0x68] sm:$0xf] %vm275_vm0, %v349_v27  ;;  %v518_v39 = vcombine.low %v35_v31, %v36_v32  ;;  %s448_s20 = smov 96   ;;  %vm127_vm1 = vcmask 261120  }
  0x1d   :  { %294 = vst.msk [vmem:[#allocation5 + $0x74] sm:$0xf] %vm275_vm0, %v351_v28  ;;  %304 = vst.msk [vmem:[#allocation5 + $0xb0] sm:$0xf] %vm275_vm0, %v361_v30  ;;  %vm152_vm2 = vcmask 523264   ;;  %vm169_vm3 = vcmask 785408  }
  0x1e   :  { %306 = vst.msk [vmem:[#allocation5 + $0xbc] sm:$0xf] %vm275_vm0, %v363_v33  ;;  %300 = vst.msk [vmem:[#allocation5 + $0x98] sm:$0xf] %vm275_vm0, %v357_v34  ;;  %s449_s21 = smov [#allocation5]  }
  0x1f   :  { %302 = vst.msk [vmem:[#allocation5 + $0xa4] sm:$0xf] %vm275_vm0, %v359_v35  ;;  %89 = vrot.lane.b32.xlu1 %v500_v36, %s447_s0  ;;  %87 = vrot.lane.b32.xlu0 %v507_v37, %s447_s0  ;;  %s312_s22 = sshll.u32 %s449_s21, 4  ;;  %s313_s22 = int_to_ptr.vmem [resolvable:$true] %s312_s22 }
  0x20   :  { %s418_s23 = scalar_lea.vmem %s313_s22, 3072  ;;  %p423_p9 = scmp.lt.s32.totalorder %s313_s22, %s313_s22 }
  0x21   :  { %p419_p8 = scmp.ne.s32.totalorder %s313_s22, %s418_s23  ;;  %p424_p10 = scmp.lt.s32.totalorder %s418_s23, %s418_s23 }
  0x23   :  { %93 = vrot.lane.b32.xlu1 %v514_v38, %s447_s0  ;;  %91 = vrot.lane.b32.xlu0 %v518_v39, %s447_s0  ;;  %p425_p11 = por %p424_p10, %p423_p9 }
  0x25   :  { %p426_p12 = pnand %p425_p11, %p419_p8 }
  0x27   :  { %97 = vrot.lane.b32.xlu1 %v491_v21, %s445_s16  ;;  %95 = vrot.lane.b32.xlu0 %v478_v10, %s445_s16 }
  0x2b   :  { %101 = vrot.lane.b32.xlu1 %v485_v15, %s445_s16  ;;  %99 = vrot.lane.b32.xlu0 %v476_v3, %s445_s16 }
  0x2f   :  { %105 = vrot.lane.b32.xlu1 %v500_v36, %s445_s16  ;;  %103 = vrot.lane.b32.xlu0 %v507_v37, %s445_s16 }
  0x33   :  { %109 = vrot.lane.b32.xlu1 %v514_v38, %s445_s16  ;;  %107 = vrot.lane.b32.xlu0 %v518_v39, %s445_s16 }
  0x37   :  { %113 = vrot.lane.b32.xlu1 %v491_v21, %s448_s20  ;;  %111 = vrot.lane.b32.xlu0 %v478_v10, %s448_s20 }
  0x3b   :  { %117 = vrot.lane.b32.xlu1 %v485_v15, %s448_s20  ;;  %115 = vrot.lane.b32.xlu0 %v476_v3, %s448_s20 }
  0x3f   :  { %121 = vrot.lane.b32.xlu1 %v500_v36, %s448_s20  ;;  %119 = vrot.lane.b32.xlu0 %v507_v37, %s448_s20 }
  0x43   :  { %125 = vrot.lane.b32.xlu1 %v514_v38, %s448_s20  ;;  %123 = vrot.lane.b32.xlu0 %v518_v39, %s448_s20 }
  0x89   :  { %v84_v40 = vpop.permute.xlu1 %83  ;;  %v80_v41 = vpop.permute.xlu0 %79 }
  0x8a   :  { %v130_v57 = vsel %vm127_vm1, %v478_v10, %v80_v41  ;;  %v136_v6 = vsel %vm127_vm1, %v476_v3, %v84_v40 }
  0x8d   :  { %v86_v42 = vpop.permute.xlu1 %85  ;;  %v82_v43 = vpop.permute.xlu0 %81 }
  0x8e   :  { %v133_v56 = vsel %vm127_vm1, %v491_v21, %v82_v43  ;;  %v139_v2 = vsel %vm127_vm1, %v485_v15, %v86_v42 }
  0x91   :  { %v90_v44 = vpop.permute.xlu1 %89  ;;  %v88_v45 = vpop.permute.xlu0 %87 }
  0x92   :  { %v145_v15 = vsel %vm127_vm1, %v500_v36, %v90_v44  ;;  %v142_v17 = vsel %vm127_vm1, %v507_v37, %v88_v45 }
  0x95   :  { %v94_v46 = vpop.permute.xlu1 %93  ;;  %v92_v47 = vpop.permute.xlu0 %91 }
  0x96   :  { %v151_v26 = vsel %vm127_vm1, %v514_v38, %v94_v46  ;;  %v148_v29 = vsel %vm127_vm1, %v518_v39, %v92_v47 }
  0x99   :  { %v98_v48 = vpop.permute.xlu1 %97  ;;  %v96_v49 = vpop.permute.xlu0 %95 }
  0x9a   :  { %v156_v58 = vsel %vm152_vm2, %v133_v56, %v98_v48  ;;  %v154_v60 = vsel %vm152_vm2, %v130_v57, %v96_v49 }
  0x9d   :  { %v102_v50 = vpop.permute.xlu1 %101  ;;  %v100_v51 = vpop.permute.xlu0 %99 }
  0x9e   :  { %v160_v7 = vsel %vm152_vm2, %v139_v2, %v102_v50  ;;  %v158_v9 = vsel %vm152_vm2, %v136_v6, %v100_v51 }
  0xa1   :  { %v106_v52 = vpop.permute.xlu1 %105  ;;  %v104_v53 = vpop.permute.xlu0 %103 }
  0xa2   :  { %v164_v18 = vsel %vm152_vm2, %v145_v15, %v106_v52  ;;  %v162_v20 = vsel %vm152_vm2, %v142_v17, %v104_v53 }
  0xa5   :  { %v110_v54 = vpop.permute.xlu1 %109  ;;  %v108_v55 = vpop.permute.xlu0 %107 }
  0xa6   :  { %v168_v30 = vsel %vm152_vm2, %v151_v26, %v110_v54  ;;  %v166_v32 = vsel %vm152_vm2, %v148_v29, %v108_v55 }
  0xa9   :  { %v114_v59 = vpop.permute.xlu1 %113  ;;  %v112_v62 = vpop.permute.xlu0 %111 }
  0xaa   :  { %v173_v61 = vsel %vm169_vm3, %v156_v58, %v114_v59  ;;  %v171_v1 = vsel %vm169_vm3, %v154_v60, %v112_v62 }
  0xab   :  { %v336_v63 = vcombine.low %v173_v61, %v173_v61  ;;  %v338_v0 = vcombine.high %v173_v61, %v173_v61  ;;  %v332_v4 = vcombine.low %v171_v1, %v171_v1  ;;  %v334_v5 = vcombine.high %v171_v1, %v171_v1 }
  0xad   :  { %279 = vst [vmem:[#allocation5 + $0x18] sm:$0xff] %v336_v63  ;;  %281 = vst [vmem:[#allocation5 + $0x24] sm:$0xff] %v338_v0  ;;  %v118_v8 = vpop.permute.xlu1 %117  ;;  %v116_v11 = vpop.permute.xlu0 %115 }
  0xae   :  { %274 = vst [vmem:[#allocation5] sm:$0xff] %v332_v4  ;;  %277 = vst [vmem:[#allocation5 + $0xc] sm:$0xff] %v334_v5  ;;  %v177_v10 = vsel %vm169_vm3, %v160_v7, %v118_v8  ;;  %v175_v14 = vsel %vm169_vm3, %v158_v9, %v116_v11 }
  0xaf   :  { %v344_v12 = vcombine.low %v177_v10, %v177_v10  ;;  %v346_v13 = vcombine.high %v177_v10, %v177_v10  ;;  %v340_v3 = vcombine.low %v175_v14, %v175_v14  ;;  %v342_v16 = vcombine.high %v175_v14, %v175_v14 }
  0xb1   :  { %287 = vst [vmem:[#allocation5 + $0x48] sm:$0xff] %v344_v12  ;;  %289 = vst [vmem:[#allocation5 + $0x54] sm:$0xff] %v346_v13  ;;  %v122_v19 = vpop.permute.xlu1 %121  ;;  %v120_v22 = vpop.permute.xlu0 %119 }
  0xb2   :  { %283 = vst [vmem:[#allocation5 + $0x30] sm:$0xff] %v340_v3  ;;  %285 = vst [vmem:[#allocation5 + $0x3c] sm:$0xff] %v342_v16  ;;  %v181_v21 = vsel %vm169_vm3, %v164_v18, %v122_v19  ;;  %v179_v25 = vsel %vm169_vm3, %v162_v20, %v120_v22 }
  0xb3   :  { %v352_v23 = vcombine.low %v181_v21, %v181_v21  ;;  %v354_v24 = vcombine.high %v181_v21, %v181_v21  ;;  %v348_v27 = vcombine.low %v179_v25, %v179_v25  ;;  %v350_v28 = vcombine.high %v179_v25, %v179_v25 }
  0xb5   :  { %295 = vst [vmem:[#allocation5 + $0x78] sm:$0xff] %v352_v23  ;;  %297 = vst [vmem:[#allocation5 + $0x84] sm:$0xff] %v354_v24  ;;  %v126_v31 = vpop.permute.xlu1 %125  ;;  %v124_v34 = vpop.permute.xlu0 %123 }
  0xb6   :  { %291 = vst [vmem:[#allocation5 + $0x60] sm:$0xff] %v348_v27  ;;  %293 = vst [vmem:[#allocation5 + $0x6c] sm:$0xff] %v350_v28  ;;  %v185_v33 = vsel %vm169_vm3, %v168_v30, %v126_v31  ;;  %v183_v37 = vsel %vm169_vm3, %v166_v32, %v124_v34 }
  0xb7   :  { %v360_v35 = vcombine.low %v185_v33, %v185_v33  ;;  %v362_v36 = vcombine.high %v185_v33, %v185_v33  ;;  %v356_v38 = vcombine.low %v183_v37, %v183_v37  ;;  %v358_v40 = vcombine.high %v183_v37, %v183_v37 }
  0xb9   :  { %303 = vst [vmem:[#allocation5 + $0xa8] sm:$0xff] %v360_v35  ;;  %305 = vst [vmem:[#allocation5 + $0xb4] sm:$0xff] %v362_v36 }
  0xba   :  { %299 = vst [vmem:[#allocation5 + $0x90] sm:$0xff] %v356_v38  ;;  %301 = vst [vmem:[#allocation5 + $0x9c] sm:$0xff] %v358_v40 }
  0xbb   :  { %429 = shalt.err (!%p426_p12)
}
  0xbc   :  { %s430_s26 = scalar_lea.hbm %s593_s1, 3072 }
  0xbd   :  { %p431_p13 = scmp.ne.s32.totalorder %s593_s1, %s430_s26  ;;  %p434_p0 = scmp.lt.u32.totalorder %s430_s26, %s593_s1 }
  0xbf   :  { %p436_p1 = pnand %p434_p0, %p431_p13 }
  0xc1   :  { %439 = shalt.err (!%p436_p1)
}
  0xc2   :  { %s450_s2 = smov 192   ;;  %s451_s3 = smov 12  }
  0xc3   :  { %318 = dma.vmem_to_hbm [thread:$0]  %s313_s22, 3072, %s593_s1, [#allocation4], %s450_s2, %s450_s2, %s451_s3  }
  0xc4   :  { %442 = dma.done.wait [#allocation4], 3072  }
  0xc5   :  { %443 = vsyncadd [#allocation4], 4294964224 }
  0xc6   :  { %322 = vsyncpa [#allocation3], 1 }
  0xc7   :  { %323 = vsyncpa [#allocation4], 1 }

// kernel: tpu_custom_call.1
= control target key start
LH: loop header
LB: loop body
LE: loop exit
PB: predicated region body
PF: predicated region fallthrough
CT: control target
= control target key end

     0   :  { %s5862_s0 = inlined_call_operand.hbm [shape: bf16[1,26,26,64], index: 0, kind: input, shape index: {}]   ;;  %s5863_s1 = inlined_call_operand.hbm [shape: bf16[1,26,26,64], index: 1, kind: input, shape index: {}]   ;;  %s5864_s2 = inlined_call_operand.hbm [shape: bf16[3,3,64,64], index: 2, kind: input, shape index: {}]   ;;  %s5865_s3 = inlined_call_operand.vmem [shape: f32[1,64], index: 3, kind: input, shape index: {}]   ;;  %s5866_s4 = inlined_call_operand.hbm [shape: f32[1,24,24,64], index: 4, kind: output, shape index: {}]  }
   0x1   :  { %5900 = sst [smem:[#allocation36_spill]] %s5862_s0 }
   0x2   :  { %5901 = sst [smem:[#allocation37_spill]] %s5866_s4 }
   0x3   :  { %9 = vsyncpa [#allocation3], 0 }
   0x4   :  { %11 = vsyncpa [#allocation3 + $0x1], 0 }
   0x5   :  { %12 = vsyncpa [#allocation6], 0 }
   0x6   :  { %14 = vsyncpa [#allocation6 + $0x1], 0 }
   0x7   :  { %15 = vsyncpa [#allocation4], 0 }
   0x8   :  { %17 = vsyncpa [#allocation4 + $0x1], 0  ;;  %s4595_s15 = smov 0   ;;  %s4597_s16 = smov 0  }
   0x9   :  { %s4599_s17 = smov 0   ;;  %s4601_s18 = smov 0  }
   0xa   :  { %s4603_s19 = smov 0   ;;  %s4605_s20 = smov 0  }
   0xb   :  { %s4607_s21 = smov 0   ;;  %s4609_s22 = smov 0  }
   0xc   :  { %s4611_s23 = smov 0  }
   0xd LB: > { %5902 = sst [smem:[#allocation13_spill]] %s4536_s18  ;;  %s4641_s24 = sadd.s32 4294967295, %s4556_s23   ;;  %s4556_s23 = sphi %s4611_s23, %s23_s23   ;;  %s4552_s22 = sphi %s4609_s22, %s5988_s22   ;;  %s4548_s21 = sphi %s4607_s21, %s5987_s21   ;;  %s4544_s20 = sphi %s4605_s20, %s5986_s20   ;;  %s4540_s19 = sphi %s4603_s19, %s5985_s19   ;;  %s4536_s18 = sphi %s4601_s18, %s5984_s18   ;;  %s4532_s17 = sphi %s4599_s17, %s5983_s17   ;;  %s4528_s16 = sphi %s4597_s16, %s5982_s16   ;;  %s4524_s15 = sphi %s4595_s15, %s5981_s15  }
   0xe   : > { %s3250_s25 = sadd.s32 4294967294, %s4556_s23   ;;  %s32_s26 = sadd.s32 1, %s4552_s22 }
   0xf   : > { %s44_s27 = sadd.s32 1, %s4544_s20  ;;  %p33_p0 = scmp.ge.s32.totalorder %s32_s26, 3 }
  0x10   : > { %p51_p1 = scmp.ne.s32.totalorder %s4544_s20, %s4540_s19  ;;  %p52_p2 = scmp.eq.s32.totalorder %s4556_s23, 0 }
  0x11   : > { %p5867_p3 = scmp.ne.s32.totalorder %s4540_s19, %s4536_s18  ;;  %s5990_s26 = smov (%p33_p0, %s32_s26), 0 }
  0x12   : > { %5903 = sst [smem:[#allocation14_spill]] %s5990_s26  ;;  %p4658_p4 = por %p52_p2, %p51_p1 }
  0x13   : > { %p5870_p5 = scmp.eq.s32.totalorder %s4641_s24, 0  ;;  %s40_s29 = ssub.s32 %s4552_s22, %s5990_s26 }
  0x14   : > { %s5904_s28 = scalar_select %p4658_p4, 1, 0 }
  0x15   : > { %s3514_s30 = sshll.u32 %s4552_s22, 2  ;;  %p42_p6 = scmp.eq.s32.totalorder %s40_s29, 0 }
  0x16   : > { %p4671_p7 = por %p5870_p5, %p5867_p3  ;;  %s3515_s6 = sadd.s32 4, %s3514_s30 }
  0x17   : > { %s3516_s7 = sshll.u32 %s5990_s26, 2  ;;  %s76_s10 = sadd.s32 1, %s4532_s17 }
  0x18   : > { %s5905_s5 = scalar_select %p4671_p7, 1, 0 }
  0x19   : > { %s4677_s8 = scalar_select %p42_p6, %s4544_s20, %s44_s27  }
  0x1a   : > { %s3517_s9 = sadd.s32 4, %s3516_s7  ;;  %p83_p8 = scmp.ne.s32.totalorder %s4532_s17, %s4528_s16 }
  0x1b   : > { %5906 = sst [smem:[#allocation15_spill]] %s4677_s8  ;;  %s72_s11 = ssub.s32 %s3515_s6, %s3517_s9 }
  0x1c   : > { %p74_p9 = scmp.eq.s32.totalorder %s72_s11, 0  ;;  %p89_p10 = scmp.ne.s32.totalorder %s4528_s16, %s4524_s15 }
  0x1d   : > { %p4686_p11 = por %p83_p8, %p52_p2  ;;  %p157_p12 = scmp.eq.s32.totalorder %s4641_s24, 2 }
  0x1e   : > { %s4692_s13 = scalar_select %p74_p9, %s4532_s17, %s76_s10  }
  0x1f   : > { %s5907_s12 = scalar_select %p4686_p11, 1, 0 }
  0x20   : > { %5908 = sst [smem:[#allocation16_spill]] %s4692_s13  ;;  %p4696_p13 = por %p89_p10, %p5870_p5 }
  0x21   : > { %p4703_p0 = por %p157_p12, %p51_p1  ;;  %p163_p6 = scmp.eq.s32.totalorder %s3250_s25, 2 }
  0x22   : > { %s5909_s14 = scalar_select %p4696_p13, 1, 0 }
  0x23   : > { %s5910_s27 = scalar_select %p4703_p0, 1, 0 }
  0x24   : > { %p3253_p3 = scmp.ge.s32.totalorder %s4556_s23, 1  ;;  %p170_p7 = scmp.lt.s32.totalorder %s4556_s23, 4 }
  0x25   : > { %p5911_p2 = scmp.ne.s32.totalorder %s4540_s19, %s4536_s18  ;;  %s4558_s30 = smov [#allocation7]  }
  0x26   : > { %p4716_p9 = pnand %p3253_p3, %p170_p7  ;;  %s182_s6 = sshll.u32 %s4558_s30, 4  ;;  %s183_s6 = int_to_ptr.vmem [resolvable:$true] %s182_s6 }
  0x27   : > { %p4712_p8 = por %p163_p6, %p5911_p2  ;;  %s4355_s10 = scalar_lea.hbm %s5864_s2, 4608 }
  0x28   : > { %s5914_s29 = scalar_select %p4716_p9, 1, 0 }
  0x29   : > { %s5912_s15 = scalar_select %p4712_p8, 1, 0 }
  0x2a   : > { %p4167_p1 = pneg %p4716_p9  ;;  %p4356_p3 = scmp.ne.s32.totalorder %s5864_s2, %s4355_s10 }
  0x2b   : > { %5913 = sst [smem:[#allocation17_spill]] %s5912_s15  ;;  %p4362_p2 = scmp.lt.u32.totalorder %s4355_s10, %s5864_s2 }
  0x2c   : > { %p4724_p10 = pnand %p4167_p1, %p5870_p5 }
  0x2e   : > { %p4357_p7 = pneg %p4724_p10 }
  0x30   : > { %p4358_p12 = pnand %p4357_p7, %p4356_p3 }
  0x32   : > { %p4359_p6 = pneg %p4358_p12 }
  0x34   : > { %p4364_p1 = pnand %p4362_p2, %p4359_p6 }
  0x36   : > { %4367 = shalt.err (!%p4364_p1)
}
  0x37   : > { %s4368_s13 = scalar_lea.vmem %s183_s6, 4608  ;;  %p4376_p13 = scmp.lt.s32.totalorder %s183_s6, %s183_s6 }
  0x38   : > { %p4369_p5 = scmp.ne.s32.totalorder %s183_s6, %s4368_s13  ;;  %p4377_p9 = scmp.lt.s32.totalorder %s4368_s13, %s4368_s13 }
  0x3a   : > { %p4371_p8 = pnand %p4369_p5, %p4357_p7  ;;  %p4378_p11 = por %p4377_p9, %p4376_p13 }
  0x3c   : > { %p4372_p0 = pneg %p4371_p8 }
  0x3e   : > { %p4379_p4 = pnand %p4378_p11, %p4372_p0 }
  0x40   : > { %4382 = shalt.err (!%p4379_p4)
}
  0x41   : > { %s4559_s26 = smov 64   ;;  %s4560_s7 = smov 4  }
  0x42   : > { %4170 = dma.hbm_to_vmem [thread:$0]  (!%p4724_p10), %s5864_s2, 4608, %s183_s6, [#allocation6], %s4559_s26, %s4559_s26, %s4560_s7  }
  0x43   : > { %p3255_p3 = scmp.ge.s32.totalorder %s4556_s23, 3 }
  0x44   : > { %p5916_p12 = scmp.ne.s32.totalorder (!%p3255_p3), %s5904_s28, 0 }
  0x45   : > { %195 = sbr.rel (%p3255_p3) target bundleno = 136 (0x88), region = 24 }
  0x4c   : > { %198 = sbr.rel (!%p5916_p12) target bundleno = 108 (0x6c), region = 28  ;;  %s199_s8 = sand.u32 (%p5916_p12), 1, %s4544_s20  }
  0x4d   : > { %s3256_s13 = sshll.u32 (%p5916_p12), %s199_s8, 7  ;;  %s4748_s10 = scalar_lea.sflag (%p5916_p12), [#allocation3], %s199_s8 }
  0x4e   : > { %s203_s30 = scalar_lea.vmem (%p5916_p12), [#allocation2], %s3256_s13  ;;  %s3520_s15 = sshll.u32 (%p5916_p12), %s4552_s22, 11 }
  0x4f   : > { %s5917_s0 = sld [smem:[#allocation36_spill]] (%p5916_p12)  ;;  %s221_s6 = sshll.u32 (%p5916_p12), %s203_s30, 4  ;;  %s222_s6 = int_to_ptr.vmem [resolvable:$true] %s221_s6 }
  0x55   : > { %s4754_s4 = scalar_lea.hbm %s5917_s0, %s3520_s15  ;;  %s4387_s9 = scalar_lea.hbm %s5917_s0, 6656 }
  0x56   : > { %s4383_s28 = scalar_lea.hbm %s4754_s4, 2048  ;;  %p4388_p5 = scmp.lt.u32.totalorder %s4754_s4, %s5917_s0 }
  0x57   : > { %p4384_p4 = scmp.ne.s32.totalorder %s4754_s4, %s4383_s28  ;;  %p4389_p11 = scmp.lt.u32.totalorder %s4387_s9, %s4383_s28 }
  0x58   : > { %p4391_p0 = scmp.lt.u32.totalorder %s4383_s28, %s4754_s4 }
  0x59   : > { %p4390_p13 = por %p4389_p11, %p4388_p5 }
  0x5b   : > { %p4392_p8 = por %p4391_p0, %p4390_p13 }
  0x5d   : > { %p4393_p9 = pnand %p4392_p8, %p4384_p4 }
  0x5f   : > { %4396 = shalt.err (!%p4393_p9)
}
  0x60   : > { %s4397_s18 = scalar_lea.vmem %s222_s6, 2048  ;;  %s4561_s15 = smov [#allocation2]  }
  0x61   : > { %p4398_p10 = scmp.ne.s32.totalorder %s222_s6, %s4397_s18  ;;  %s4401_s13 = sshll.u32 %s4561_s15, 4  ;;  %s4402_s13 = int_to_ptr.vmem [resolvable:$false] %s4401_s13 }
  0x62   : > { %s4403_s30 = scalar_lea.vmem %s4402_s13, 4096  ;;  %p4404_p7 = scmp.lt.s32.totalorder %s222_s6, %s4402_s13 }
  0x63   : > { %p4405_p6 = scmp.lt.s32.totalorder %s4403_s30, %s4397_s18 }
  0x65   : > { %p4406_p2 = por %p4405_p6, %p4404_p7 }
  0x67   : > { %p4407_p1 = pnand %p4406_p2, %p4398_p10 }
  0x69   : > { %4410 = shalt.err (!%p4407_p1)
}
  0x6a   : > { %s4562_s25 = smov 64   ;;  %s4563_s26 = smov 4  }
  0x6b   : > { %227 = dma.hbm_to_vmem [thread:$0]  %s4754_s4, 2048, %s222_s6, %s4748_s10, %s4562_s25, %s4562_s25, %s4563_s26  }
  0x6c PF: > { %s231_s28 = sand.u32 1, %s4556_s23   ;;  %s233_s7 = sand.u32 1, %s4532_s17  }
  0x6d   : > { %s3266_s9 = sshll.u32 %s233_s7, 5  ;;  %s3523_s11 = sshll.u32 %s4552_s22, 11 }
  0x6e   : > { %s3171_s18 = scalar_lea.hbm %s5863_s1, %s3523_s11  ;;  %s235_s13 = scalar_lea.vmem [#allocation5], %s3266_s9 }
  0x6f   : > { %s247_s30 = sshll.u32 %s235_s13, 4  ;;  %s4774_s0 = scalar_lea.hbm %s3171_s18, 2048  ;;  %s4776_s30 = int_to_ptr.vmem [resolvable:$true] %s247_s30 }
  0x70   : > { %s4778_s4 = scalar_lea.sflag [#allocation6], %s231_s28  ;;  %s4439_s10 = scalar_lea.hbm %s3171_s18, 2560 }
  0x71   : > { %p4412_p3 = scmp.ne.s32.totalorder %s4774_s0, %s4439_s10  ;;  %p5918_p12 = scmp.ne.s32.totalorder %s5907_s12, 0 }
  0x72   : > { %s4415_s26 = scalar_lea.hbm %s5863_s1, 6656  ;;  %p4416_p11 = scmp.lt.u32.totalorder %s4774_s0, %s5863_s1 }
  0x73   : > { %p4413_p4 = pnand %p4412_p3, %p5918_p12  ;;  %p4417_p13 = scmp.lt.u32.totalorder %s4415_s26, %s4439_s10 }
  0x74   : > { %p4419_p8 = scmp.lt.u32.totalorder %s4439_s10, %s4774_s0 }
  0x75   : > { %p4414_p5 = pneg %p4413_p4  ;;  %p4418_p0 = por %p4417_p13, %p4416_p11 }
  0x77   : > { %p4420_p9 = por %p4419_p8, %p4418_p0 }
  0x79   : > { %p4421_p10 = pnand %p4420_p9, %p4414_p5 }
  0x7b   : > { %4424 = shalt.err (!%p4421_p10)
}
  0x7c   : > { %s4425_s28 = scalar_lea.vmem %s4776_s30, 512  ;;  %s4564_s11 = smov [#allocation5]  }
  0x7d   : > { %p4426_p7 = scmp.ne.s32.totalorder %s4776_s30, %s4425_s28  ;;  %s4429_s8 = sshll.u32 %s4564_s11, 4  ;;  %s4430_s8 = int_to_ptr.vmem [resolvable:$false] %s4429_s8 }
  0x7e   : > { %s4431_s15 = scalar_lea.vmem %s4430_s8, 1024  ;;  %p4432_p1 = scmp.lt.s32.totalorder %s4776_s30, %s4430_s8 }
  0x7f   : > { %p4427_p6 = pnand %p4426_p7, %p5918_p12  ;;  %p4433_p3 = scmp.lt.s32.totalorder %s4431_s15, %s4425_s28 }
  0x81   : > { %p4428_p2 = pneg %p4427_p6  ;;  %p4434_p4 = por %p4433_p3, %p4432_p1 }
  0x83   : > { %p4435_p11 = pnand %p4434_p4, %p4428_p2 }
  0x85   : > { %4438 = shalt.err (!%p4435_p11)
}
  0x86   : > { %s4565_s18 = smov 64   ;;  %s4566_s13 = smov 4  }
  0x87   : > { %4160 = dma.hbm_to_vmem [thread:$0]  (%p5918_p12), %s4774_s0, 512, %s4776_s30, %s4778_s4, %s4565_s18, %s4565_s18, %s4566_s13  }
  0x88 PF: > { %p5919_p5 = scmp.ne.s32.totalorder %s5914_s29, 0 }
  0x8a   : > { %259 = sbr.rel (%p5919_p5) target bundleno = 632 (0x278), region = 36 }
  0x91   : > { %s4804_s10 = sand.u32 1, %s4540_s19   ;;  %p5920_p13 = scmp.ne.s32.totalorder %s5905_s5, 0 }
  0x92   : > { %s3270_s6 = sshll.u32 %s4804_s10, 7  ;;  %s262_s25 = scalar_lea.sflag [#allocation3], %s4804_s10 }
  0x93   : > { %s4808_s26 = scalar_lea.vmem [#allocation2], %s3270_s6 }
  0x94   : > { %4505 = dma.done.wait (%p5920_p13), %s262_s25, 2048  }
  0x95   : > { %4507 = vsyncadd (%p5920_p13), %s262_s25, 4294965248  ;;  %s270_s0 = sand.u32 1, %s4641_s24   ;;  %s272_s12 = sand.u32 1, %s4528_s16  }
  0x96   : > { %s3271_s29 = sshll.u32 %s272_s12, 5  ;;  %s271_s30 = scalar_lea.sflag [#allocation6], %s270_s0 }
  0x97   : > { %s4816_s4 = scalar_lea.vmem [#allocation5], %s3271_s29  ;;  %p5921_p12 = scmp.ne.s32.totalorder %s5909_s14, 0 }
  0x99   : > { %4509 = dma.done.wait (%p5921_p12), %s271_s30, 512  }
  0x9a   : > { %4511 = vsyncadd (%p5921_p12), %s271_s30, 4294966784  ;;  %p5922_p0 = scmp.eq.s32.totalorder %s4641_s24, 0 }
  0x9c   : > { %4513 = dma.done.wait (%p5922_p0), [#allocation6], 4608   ;;  %p5923_p8 = pmov %p5922_p0 }
  0x9d   : > { %v4259_v0 = vld [vmem:[#allocation7 + $0x20] sm:$0xff]   ;;  %v4261_v2 = vld [vmem:[#allocation7 + $0x28] sm:$0xff]   ;;  %vm399_vm0 = vsmask.f32 3328  ;;  %v4263_v4 = vld [vmem:[#allocation7 + $0x30] sm:$0xff]   ;;  %vm743_vm2 = vcmask 523264  }
  0x9e   : > { %4515 = vsyncadd (%p5923_p8), [#allocation6], 4294962688  ;;  %v4260_v1 = vld [vmem:[#allocation7 + $0x80] sm:$0xff]   ;;  %3668 = vmatprep.subr.bf16.mxu1 %v4259_v0  ;;  %v4262_v3 = vld [vmem:[#allocation7 + $0x88] sm:$0xff]   ;;  %vm400_vm1 = vsmask.f32 7440 }
  0x9f   : > { %3796 = vmatprep.subr.bf16.mxu0 %v4260_v1  ;;  %3669 = vmatpush3.bf16.msra.mxu1 %v4259_v0  ;;  %v4264_v5 = vld [vmem:[#allocation7 + $0x90] sm:$0xff]   ;;  %v4265_v6 = vld [vmem:[#allocation7 + $0x38] sm:$0xff]   ;;  %v4827_v7 = vld [vmem:[%s4808_s26] sm:$0xf]  ;;  %v5924_v33 = vmov 0  ;;  %vm1166_vm4 = vcmask 1042432  }
  0xa0   : > { %3797 = vmatpush3.bf16.msra.mxu0 %v4260_v1  ;;  %3670 = vmatprep.subr.bf16.mxu1 %v4261_v2  ;;  %v4830_v8 = vld [vmem:[%s4808_s26 + $0x4] sm:$0xf]  ;;  %v4833_v9 = vld [vmem:[%s4808_s26 + $0x8] sm:$0xf]  ;;  %v4266_v10 = vld [vmem:[#allocation7 + $0x98] sm:$0xff]   ;;  %v403_v11 = vshrl.u32 %v4827_v7, 16 }
  0xa1   : > { %3798 = vmatprep.subr.bf16.mxu0 %v4262_v3  ;;  %v406_v12 = vshll.u32 %v4827_v7, 16  ;;  %v412_v13 = vshll.u32 %v4830_v8, 16  ;;  %v416_v14 = vshrl.u32 %v4830_v8, 16  ;;  %v4840_v15 = vld [vmem:[%s4808_s26 + $0x10] sm:$0xf]  ;;  %v422_v16 = vshll.u32 %v4833_v9, 16  ;;  %vm4860_vm3 = vmor %vm399_vm0, %vm400_vm1 }
  0xa2   : > { %v426_v17 = vshrl.u32 %v4833_v9, 16  ;;  %v4845_v18 = vld [vmem:[%s4808_s26 + $0xc] sm:$0x1]  ;;  %v405_v19 = vrot.slane %v403_v11, 4  ;;  %v4848_v23 = vld [vmem:[%s4808_s26 + $0x14] sm:$0xf] }
  0xa3   : > { %3671 = vmatpush3.bf16.msra.mxu1 %v4261_v2  ;;  %v408_v20 = vrot.slane %v406_v12, 5  ;;  %v414_v21 = vrot.slane %v412_v13, 5  ;;  %v418_v22 = vrot.slane %v416_v14, 4  ;;  %v424_v24 = vrot.slane %v422_v16, 5  ;;  %v4851_v27 = vld [vmem:[#allocation7] sm:$0xff]   ;;  %s4156_s24 = smul.u32 192, %s4804_s10 }
  0xa4   : > { %3799 = vmatpush3.bf16.msra.mxu0 %v4262_v3  ;;  %3672 = vmatprep.subr.bf16.mxu1 %v4263_v4  ;;  %v428_v25 = vrot.slane %v426_v17, 4  ;;  %v5878_v26 = vrot.slane %v4833_v9, 5  ;;  %v4854_v30 = vld [vmem:[%s4808_s26 + $0x18] sm:$0xf]  ;;  %v432_v31 = vshll.u32 %v4845_v18, 16  ;;  %v437_v32 = vshrl.u32 %v4840_v15, 16 }
  0xa5   : > { %3800 = vmatprep.subr.bf16.mxu0 %v4264_v5  ;;  %v409_v28 = vor.u32 %v408_v20, %v405_v19  ;;  %v419_v29 = vor.u32 %v418_v22, %v414_v21  ;;  %v5925_v33 = vsel %vm4860_vm3, 4294967295, %v5924_v33  ;;  %v4865_v35 = vld [vmem:[%s4808_s26 + $0x1c] sm:$0x1]  ;;  %v4868_v36 = vld [vmem:[%s4808_s26 + $0x20] sm:$0xf]  ;;  %v440_v37 = vshll.u32 %v4840_v15, 16 }
  0xa6   : > { %5926 = vst [vmem:[#allocation18_spill] sm:$0xff] %v5925_v33  ;;  %v429_v34 = vor.u32 %v428_v25, %v424_v24  ;;  %v446_v38 = vshll.u32 %v4848_v23, 16  ;;  %v450_v39 = vshrl.u32 %v4848_v23, 16  ;;  %v4873_v40 = vld [vmem:[#allocation7 + $0xa0] sm:$0xff]   ;;  %v434_v44 = vrot.slane %v432_v31, 5  ;;  %v4271_v22 = vld [vmem:[#allocation7 + $0x8] sm:$0xff]  }
  0xa7   : > { %3673 = vmatpush3.bf16.msra.mxu1 %v4263_v4  ;;  %v410_v41 = vrot.slane %v409_v28, 4  ;;  %v420_v42 = vrot.slane %v419_v29, 4  ;;  %v4876_v43 = vld [vmem:[%s4808_s26 + $0x24] sm:$0xf]  ;;  %v439_v45 = vrot.slane %v437_v32, 4  ;;  %v442_v47 = vrot.slane %v440_v37, 5 }
  0xa8   : > { %3801 = vmatpush3.bf16.msra.mxu0 %v4264_v5  ;;  %3674 = vmatprep.subr.bf16.mxu1 %v4265_v6  ;;  %v430_v46 = vrot.slane %v429_v34, 4  ;;  %v448_v48 = vrot.slane %v446_v38, 5  ;;  %v452_v49 = vrot.slane %v450_v39, 4  ;;  %v456_v52 = vshll.u32 %v4854_v30, 16  ;;  %v4894_v2 = vld [vmem:[%s4808_s26 + $0x28] sm:$0xf] }
  0xa9   : > { %3802 = vmatprep.subr.bf16.mxu0 %v4266_v10  ;;  %v415_v50 = vsel %vm4860_vm3, %v410_v41, %v414_v21  ;;  %v425_v51 = vsel %vm4860_vm3, %v420_v42, %v424_v24  ;;  %v460_v53 = vshrl.u32 %v4854_v30, 16  ;;  %v443_v56 = vor.u32 %v442_v47, %v439_v45  ;;  %v4905_v16 = vld [vmem:[%s4808_s26 + $0x30] sm:$0xf]  ;;  %v4916_v38 = vld [vmem:[%s4808_s26 + $0x34] sm:$0xf]  ;;  %s5680_s7 = scalar_lea.vmem [#allocation8], %s4156_s24 }
  0xaa   : > { %v3273_v54 = vcombine.low %v415_v50, %v425_v51  ;;  %v435_v55 = vsel %vm4860_vm3, %v430_v46, %v434_v44  ;;  %v453_v57 = vor.u32 %v452_v49, %v448_v48  ;;  %v458_v58 = vrot.slane %v456_v52, 5  ;;  %v4921_v44 = vld [vmem:[%s4808_s26 + $0x38] sm:$0xf]  ;;  %v4926_v50 = vld [vmem:[%s4808_s26 + $0x3c] sm:$0x1]  ;;  %s4157_s9 = smul.u32 3072, %s4548_s21 }
  0xab   : > { %3675 = vmatpush3.bf16.msra.mxu1 %v4265_v6  ;;  %v462_v59 = vrot.slane %v460_v53, 4  ;;  %v466_v60 = vshll.u32 %v4865_v35, 16  ;;  %v471_v61 = vshrl.u32 %v4868_v36, 16  ;;  %v444_v62 = vrot.slane %v443_v56, 4  ;;  %v5267_v33 = vld [vmem:[%s4816_s4 + $0x8] sm:$0xf] }
  0xac   : > { %3803 = vmatpush3.bf16.msra.mxu0 %v4266_v10  ;;  %3700 = vmatprep.subr.bf16.mxu1 %v4851_v27  ;;  %v454_v63 = vrot.slane %v453_v57, 4  ;;  %v474_v0 = vshll.u32 %v4868_v36, 16  ;;  %v480_v1 = vshll.u32 %v4876_v43, 16  ;;  %v484_v6 = vshrl.u32 %v4876_v43, 16  ;;  %v4898_v10 = vld [vmem:[%s4808_s26 + $0x2c] sm:$0x1] }
  0xad   : > { %3828 = vmatprep.subr.bf16.mxu0 %v4873_v40  ;;  %3676 = vmatprep.mubr.msk.bf16.mxu1 %vm743_vm2, %v3273_v54  ;;  %v463_v3 = vor.u32 %v462_v59, %v458_v58  ;;  %v468_v4 = vrot.slane %v466_v60, 5  ;;  %v473_v5 = vrot.slane %v471_v61, 4  ;;  %v449_v11 = vsel %vm4860_vm3, %v444_v62, %v448_v48  ;;  %v4934_v54 = vld [vmem:[%s4808_s26 + $0x40] sm:$0xf]  ;;  %v4270_v57 = vld [vmem:[#allocation7 + $0xa8] sm:$0xff]   ;;  %s3126_s28 = sshll.u32 %s5680_s7, 4  ;;  %s5799_s28 = int_to_ptr.vmem [resolvable:$true] %s3126_s28 }
  0xae   : > { %v459_v12 = vsel %vm4860_vm3, %v454_v63, %v458_v58  ;;  %v476_v13 = vrot.slane %v474_v0, 5  ;;  %v482_v14 = vrot.slane %v480_v1, 5  ;;  %v486_v19 = vrot.slane %v484_v6, 4  ;;  %v4942_v1 = vld [vmem:[%s4808_s26 + $0x44] sm:$0xf]  ;;  %s5973_s8 = sld [smem:[#allocation37_spill]] }
  0xaf   : > { %v464_v17 = vrot.slane %v463_v3, 4  ;;  %v3274_v20 = vcombine.low %v435_v55, %v449_v11  ;;  %v1177_v21 = vrot.slane %v4845_v18, 5  ;;  %v1187_v25 = vrot.slane %v4865_v35, 5  ;;  %v4274_v55 = vld [vmem:[#allocation7 + $0x10] sm:$0xff]   ;;  %s3110_s18 = scalar_lea.sflag [#allocation4], %s4804_s10  ;;  %s4440_s13 = scalar_lea.vmem %s5799_s28, 3072 }
  0xb0   : > { %v477_v24 = vor.u32 %v476_v13, %v473_v5  ;;  %v3393_v28 = vcombine.low %v449_v11, %v459_v12  ;;  %v490_v29 = vshll.u32 %v4894_v2, 16  ;;  %v487_v32 = vor.u32 %v486_v19, %v482_v14  ;;  %v4948_v11 = vld [vmem:[%s4808_s26 + $0x48] sm:$0xf]  ;;  %p4441_p9 = scmp.ne.s32.totalorder %s5799_s28, %s4440_s13  ;;  %p5974_p10 = scmp.ne.s32.totalorder %s5910_s27, 0 }
  0xb1   : > { %v469_v31 = vsel %vm4860_vm3, %v464_v17, %v468_v4  ;;  %3677 = vmatmul.mubr.msk.bf16.vlgmr.msra.gmra.mrb[0].mxu1 %vm743_vm2, %v3274_v20  ;;  %v494_v34 = vshrl.u32 %v4894_v2, 16  ;;  %v500_v37 = vshll.u32 %v4898_v10, 16  ;;  %v505_v45 = vshrl.u32 %v4905_v16, 16  ;;  %s4567_s6 = smov [#allocation8]  }
  0xb2   : > { %v478_v39 = vrot.slane %v477_v24, 4  ;;  %v3275_v41 = vcombine.low %v459_v12, %v469_v31  ;;  %3804 = vmatprep.mubr.msk.bf16.mxu0 %vm743_vm2, %v3393_v28  ;;  %3701 = vmatpush3.bf16.msra.mxu1 %v4851_v27  ;;  %v492_v42 = vrot.slane %v490_v29, 5  ;;  %v488_v46 = vrot.slane %v487_v32, 4  ;;  %v4276_v12 = vld [vmem:[#allocation7 + $0x18] sm:$0xff]   ;;  %v4272_v24 = vld [vmem:[#allocation7 + $0xb0] sm:$0xff]   ;;  %p4442_p7 = pnand %p4441_p9, %p5974_p10  ;;  %s4444_s25 = sshll.u32 %s4567_s6, 4  ;;  %s4445_s25 = int_to_ptr.vmem [resolvable:$false] %s4444_s25 }
  0xb3   : > { %v496_v47 = vrot.slane %v494_v34, 4  ;;  %v502_v48 = vrot.slane %v500_v37, 5  ;;  %v508_v49 = vshll.u32 %v4905_v16, 16  ;;  %3702 = vmatprep.subr.bf16.mxu1 %v4271_v22  ;;  %v507_v52 = vrot.slane %v505_v45, 4  ;;  %p4447_p2 = scmp.lt.s32.totalorder %s5799_s28, %s4445_s25 }
  0xb4   : > { %v483_v51 = vsel %vm4860_vm3, %v478_v39, %v482_v14  ;;  %3680 = vmatprep.mubr.msk.bf16.mxu1 %vm743_vm2, %v3275_v41  ;;  %v514_v27 = vshll.u32 %v4916_v38, 16  ;;  %v518_v53 = vshrl.u32 %v4916_v38, 16  ;;  %v493_v58 = vsel %vm4860_vm3, %v488_v46, %v492_v42  ;;  %v4964_v46 = vld [vmem:[#allocation7 + $0x40] sm:$0xff]   ;;  %s5797_s15 = scalar_lea.hbm %s5973_s8, %s4157_s9  ;;  %p4443_p6 = pneg %p4442_p7 }
  0xb5   : > { %v3394_v56 = vcombine.low %v469_v31, %v483_v51  ;;  %v497_v59 = vor.u32 %v496_v47, %v492_v42  ;;  %v510_v60 = vrot.slane %v508_v49, 5  ;;  %vm1167_vm5 = vcmask 1046532   ;;  %v4958_v31 = vld [vmem:[%s4808_s26 + $0x4c] sm:$0x1] }
  0xb6   : > { %v4938_v61 = vcombine.low %v483_v51, %v493_v58  ;;  %v516_v62 = vrot.slane %v514_v27, 5  ;;  %v520_v63 = vrot.slane %v518_v53, 4  ;;  %v524_v0 = vshll.u32 %v4921_v44, 16  ;;  %3703 = vmatpush3.bf16.msra.mxu1 %v4271_v22  ;;  %vm4995_vm6 = vmor %vm1166_vm4, %vm1167_vm5 }
  0xb7   : > { %3805 = vmatmul.mubr.msk.bf16.vlgmr.msra.gmra.mrb[0].mxu0 %vm743_vm2, %v3394_v56  ;;  %v498_v3 = vrot.slane %v497_v59, 4  ;;  %v511_v4 = vor.u32 %v510_v60, %v507_v52  ;;  %v528_v5 = vshrl.u32 %v4921_v44, 16  ;;  %v534_v6 = vshll.u32 %v4926_v50, 16  ;;  %3704 = vmatprep.subr.bf16.mxu1 %v4274_v55  ;;  %v4273_v56 = vld [vmem:[#allocation7 + $0xb8] sm:$0xff]  }
  0xb8   : > { %5927 = vst [vmem:[#allocation19_spill] sm:$0xff] %v4938_v61  ;;  %3829 = vmatpush3.bf16.msra.mxu0 %v4873_v40  ;;  %v521_v13 = vor.u32 %v520_v63, %v516_v62  ;;  %v526_v14 = vrot.slane %v524_v0, 5  ;;  %v539_v17 = vshrl.u32 %v4934_v54, 16  ;;  %v542_v19 = vshll.u32 %v4934_v54, 16  ;;  %v4980_v63 = vld [vmem:[%s4808_s26 + $0x54] sm:$0xf] }
  0xb9   : > { %3830 = vmatprep.subr.bf16.mxu0 %v4270_v57  ;;  %v503_v20 = vsel %vm4860_vm3, %v498_v3, %v502_v48  ;;  %3681 = vmatmul.mubr.msk.bf16.gmra.mrb[4].mxu1 %vm743_vm2, %v4938_v61  ;;  %v512_v22 = vrot.slane %v511_v4, 4  ;;  %v530_v28 = vrot.slane %v528_v5, 4  ;;  %v536_v29 = vrot.slane %v534_v6, 5 }
  0xba   : > { %v3395_v40 = vcombine.low %v493_v58, %v503_v20  ;;  %v522_v32 = vrot.slane %v521_v13, 4  ;;  %v541_v34 = vrot.slane %v539_v17, 4  ;;  %v544_v37 = vrot.slane %v542_v19, 5  ;;  %3705 = vmatpush3.bf16.msra.mxu1 %v4274_v55  ;;  %v4973_v58 = vld [vmem:[%s4808_s26 + $0x50] sm:$0xf] }
  0xbb   : > { %v517_v39 = vsel %vm4860_vm3, %v512_v22, %v516_v62  ;;  %v531_v41 = vor.u32 %v530_v28, %v526_v14  ;;  %v548_v42 = vshll.u32 %v4942_v1, 16  ;;  %v552_v45 = vshrl.u32 %v4942_v1, 16  ;;  %3706 = vmatprep.subr.bf16.mxu1 %v4276_v12  ;;  %v5006_v28 = vld [vmem:[#allocation7 + $0xc0] sm:$0xff]  }
  0xbc   : > { %3808 = vmatprep.mubr.msk.bf16.mxu0 %vm743_vm2, %v3395_v40  ;;  %3831 = vmatpush3.bf16.msra.mxu0 %v4270_v57  ;;  %v527_v47 = vsel %vm4860_vm3, %v522_v32, %v526_v14  ;;  %v4969_v48 = vcombine.low %v503_v20, %v517_v39  ;;  %v545_v49 = vor.u32 %v544_v37, %v541_v34  ;;  %v558_v51 = vshll.u32 %v4948_v11, 16 }
  0xbd   : > { %v3396_v52 = vcombine.low %v517_v39, %v527_v47  ;;  %3832 = vmatprep.subr.bf16.mxu0 %v4272_v24  ;;  %v532_v27 = vrot.slane %v531_v41, 4  ;;  %v550_v53 = vrot.slane %v548_v42, 5  ;;  %v554_v55 = vrot.slane %v552_v45, 4  ;;  %v5022_v41 = vld [vmem:[%s4808_s26 + $0x58] sm:$0xf] }
  0xbe   : > { %5928 = vst [vmem:[#allocation20_spill] sm:$0xff] %v4969_v48  ;;  %3684 = vmatprep.mubr.msk.bf16.mxu1 %vm743_vm2, %v4969_v48  ;;  %v546_v57 = vrot.slane %v545_v49, 4  ;;  %v560_v59 = vrot.slane %v558_v51, 5  ;;  %v562_v60 = vshrl.u32 %v4948_v11, 16  ;;  %v568_v62 = vshll.u32 %v4958_v31, 16  ;;  %3707 = vmatpush3.bf16.msra.mxu1 %v4276_v12 }
  0xbf   : > { %3809 = vmatmul.mubr.msk.bf16.gmra.mrb[4].mxu0 %vm743_vm2, %v3396_v52  ;;  %v537_v0 = vsel %vm4860_vm3, %v532_v27, %v536_v29  ;;  %v555_v3 = vor.u32 %v554_v55, %v550_v53  ;;  %v1176_v4 = vrot.slane %v5878_v26, 4  ;;  %v3330_v5 = vrot.slane %v4840_v15, 9  ;;  %3732 = vmatprep.subr.bf16.mxu1 %v4964_v46  ;;  %v5025_v42 = vld [vmem:[%s4808_s26 + $0x5c] sm:$0x1] }
  0xc0   : > { %3833 = vmatpush3.bf16.msra.mxu0 %v4272_v24  ;;  %v551_v6 = vsel %vm4860_vm3, %v546_v57, %v550_v53  ;;  %v4991_v13 = vcombine.low %v527_v47, %v537_v0  ;;  %v564_v12 = vrot.slane %v562_v60, 4  ;;  %v570_v14 = vrot.slane %v568_v62, 5  ;;  %v5159_v48 = vld [vmem:[%s4808_s26 + $0x7c] sm:$0x1] }
  0xc1   : > { %v3397_v19 = vcombine.low %v537_v0, %v551_v6  ;;  %v556_v20 = vrot.slane %v555_v3, 4  ;;  %3834 = vmatprep.subr.bf16.mxu0 %v4273_v56  ;;  %v5003_v22 = vsel %vm4995_vm6, %v1176_v4, %v1177_v21  ;;  %v1181_v24 = vrot.slane %v4848_v23, 5 }
  0xc2   : > { %5929 = vst [vmem:[#allocation21_spill] sm:$0xff] %v4991_v13  ;;  %5932 = vst [vmem:[#allocation22_spill] sm:$0xff] %v5003_v22  ;;  %3685 = vmatmul.mubr.msk.bf16.gmra.mrb[8].mxu1 %vm743_vm2, %v4991_v13  ;;  %v565_v29 = vor.u32 %v564_v12, %v560_v59  ;;  %v1184_v40 = vrot.slane %v4854_v30, 5  ;;  %v573_v32 = vshrl.u32 %v4973_v58, 16  ;;  %v576_v34 = vshll.u32 %v4973_v58, 16 }
  0xc3   : > { %3812 = vmatprep.mubr.msk.bf16.mxu0 %vm743_vm2, %v3397_v19  ;;  %v561_v18 = vsel %vm4860_vm3, %v556_v20, %v560_v59  ;;  %v5018_v21 = vsel %vm4995_vm6, %v3330_v5, %v1181_v24  ;;  %v1183_v37 = vrot.slane %v1181_v24, 4  ;;  %v582_v39 = vshll.u32 %v4980_v63, 16  ;;  %v5061_v24 = vld [vmem:[%s4808_s26 + $0x60] sm:$0xf] }
  0xc4   : > { %5933 = vst [vmem:[#allocation23_spill] sm:$0xff] %v5018_v21  ;;  %v566_v45 = vrot.slane %v565_v29, 4  ;;  %3835 = vmatpush3.bf16.msra.mxu0 %v4273_v56  ;;  %v5027_v47 = vcombine.low %v551_v6, %v561_v18  ;;  %v1186_v49 = vrot.slane %v1184_v40, 4  ;;  %v575_v27 = vrot.slane %v573_v32, 4 }
  0xc5   : > { %v5033_v52 = vsel %vm4995_vm6, %v1183_v37, %v1184_v40  ;;  %v578_v53 = vrot.slane %v576_v34, 5  ;;  %v584_v55 = vrot.slane %v582_v39, 5  ;;  %3860 = vmatprep.subr.bf16.mxu0 %v5006_v28  ;;  %v3331_v60 = vrot.slane %v4868_v36, 9 }
  0xc6   : > { %5934 = vst [vmem:[#allocation24_spill] sm:$0xff] %v5027_v47  ;;  %v571_v57 = vsel %vm4860_vm3, %v566_v45, %v570_v14  ;;  %3688 = vmatprep.mubr.msk.bf16.mxu1 %vm743_vm2, %v5027_v47  ;;  %v3422_v56 = vcombine.low %v5018_v21, %v5033_v52  ;;  %v5046_v59 = vsel %vm4995_vm6, %v1186_v49, %v1187_v25  ;;  %v1191_v3 = vrot.slane %v4876_v43, 5 }
  0xc7   : > { %v3398_v62 = vcombine.low %v561_v18, %v571_v57  ;;  %v579_v0 = vor.u32 %v578_v53, %v575_v27  ;;  %v586_v4 = vshrl.u32 %v4980_v63, 16  ;;  %v592_v5 = vshll.u32 %v5022_v41, 16  ;;  %v5067_v18 = vld [vmem:[%s4808_s26 + $0x64] sm:$0xf]  ;;  %v5078_v27 = vld [vmem:[%s4808_s26 + $0x68] sm:$0xf] }
  0xc8   : > { %v596_v6 = vshrl.u32 %v5022_v41, 16  ;;  %v602_v35 = vshll.u32 %v5025_v42, 16  ;;  %v1194_v12 = vrot.slane %v4894_v2, 5  ;;  %v5058_v14 = vsel %vm4995_vm6, %v3331_v60, %v1191_v3 }
  0xc9   : > { %3813 = vmatmul.mubr.msk.bf16.gmra.mrb[8].mxu0 %vm743_vm2, %v3398_v62  ;;  %v580_v25 = vrot.slane %v579_v0, 4  ;;  %v588_v19 = vrot.slane %v586_v4, 4  ;;  %v1193_v20 = vrot.slane %v1191_v3, 4  ;;  %v3423_v29 = vcombine.low %v5046_v59, %v5058_v14  ;;  %v5949_v17 = vld [vmem:[#allocation22_spill] sm:$0xff] }
  0xca   : > { %3836 = vmatprep.mubr.msk.bf16.mxu0 %vm743_vm2, %v3422_v56  ;;  %v594_v40 = vrot.slane %v592_v5, 5  ;;  %v598_v32 = vrot.slane %v596_v6, 4  ;;  %v604_v34 = vrot.slane %v602_v35, 5  ;;  %v1196_v49 = vrot.slane %v1194_v12, 4  ;;  %v5089_v5 = vld [vmem:[%s4808_s26 + $0x6c] sm:$0x1] }
  0xcb   : > { %v5071_v37 = vsel %vm4860_vm3, %v580_v25, %v584_v55  ;;  %v589_v39 = vor.u32 %v588_v19, %v584_v55  ;;  %v5075_v45 = vsel %vm4995_vm6, %v1193_v20, %v1194_v12  ;;  %v1197_v60 = vrot.slane %v4898_v10, 5  ;;  %v5092_v6 = vld [vmem:[%s4808_s26 + $0x70] sm:$0xf]  ;;  %v4277_v25 = vld [vmem:[#allocation7 + $0xc8] sm:$0xff]  }
  0xcc   : > { %v5081_v53 = vcombine.low %v571_v57, %v5071_v37  ;;  %v599_v56 = vor.u32 %v598_v32, %v594_v40  ;;  %v607_v62 = vshrl.u32 %v5061_v24, 16  ;;  %v610_v3 = vshll.u32 %v5061_v24, 16 }
  0xcd   : > { %v590_v0 = vrot.slane %v589_v39, 4  ;;  %v616_v55 = vshll.u32 %v5067_v18, 16  ;;  %v620_v4 = vshrl.u32 %v5067_v18, 16  ;;  %v5098_v10 = vsel %vm4995_vm6, %v1196_v49, %v1197_v60 }
  0xce   : > { %5935 = vst [vmem:[#allocation25_spill] sm:$0xff] %v5081_v53  ;;  %3689 = vmatmul.mubr.msk.bf16.gmra.mrb[12].mxu1 %vm743_vm2, %v5081_v53  ;;  %v600_v57 = vrot.slane %v599_v56, 4  ;;  %v609_v35 = vrot.slane %v607_v62, 4  ;;  %v626_v12 = vshll.u32 %v5078_v27, 16  ;;  %v3424_v20 = vcombine.low %v5075_v45, %v5098_v10  ;;  %v5113_v62 = vld [vmem:[%s4808_s26 + $0x74] sm:$0xf] }
  0xcf   : > { %v5103_v19 = vsel %vm4860_vm3, %v590_v0, %v594_v40  ;;  %v612_v32 = vrot.slane %v610_v3, 5  ;;  %v618_v39 = vrot.slane %v616_v55, 5  ;;  %v622_v51 = vrot.slane %v620_v4, 4  ;;  %5937 = vst [vmem:[#allocation27_spill] sm:$0xff] %v5113_v62 }
  0xd0   : > { %v5109_v56 = vsel %vm4860_vm3, %v600_v57, %v604_v34  ;;  %v628_v49 = vrot.slane %v626_v12, 5  ;;  %v3332_v60 = vrot.slane %v4905_v16, 9  ;;  %v1201_v3 = vrot.slane %v4916_v38, 5 }
  0xd1   : > { %5936 = vst [vmem:[#allocation26_spill] sm:$0xff] %v5109_v56  ;;  %3837 = vmatmul.mubr.msk.bf16.vlgmr.msra.gmra.mrb[0].mxu0 %vm743_vm2, %v3423_v29  ;;  %v5118_v40 = vcombine.low %v5103_v19, %v5109_v56  ;;  %v613_v0 = vor.u32 %v612_v32, %v609_v35  ;;  %v1204_v55 = vrot.slane %v4921_v44, 5  ;;  %v623_v34 = vor.u32 %v622_v51, %v618_v39  ;;  %v4280_v51 = vld [vmem:[#allocation7 + $0xd0] sm:$0xff]  }
  0xd2   : > { %3861 = vmatpush3.bf16.msra.mxu0 %v5006_v28  ;;  %3840 = vmatprep.mubr.msk.bf16.mxu0 %vm743_vm2, %v3424_v20  ;;  %v630_v4 = vshrl.u32 %v5078_v27, 16  ;;  %v636_v57 = vshll.u32 %v5089_v5, 16  ;;  %v641_v29 = vshrl.u32 %v5092_v6, 16  ;;  %v5131_v35 = vsel %vm4995_vm6, %v3332_v60, %v1201_v3 }
  0xd3   : > { %5938 = vst [vmem:[#allocation28_spill] sm:$0xff] %v5118_v40  ;;  %3692 = vmatprep.mubr.msk.bf16.mxu1 %vm743_vm2, %v5118_v40  ;;  %v614_v12 = vrot.slane %v613_v0, 4  ;;  %v1203_v32 = vrot.slane %v1201_v3, 4  ;;  %3862 = vmatprep.subr.bf16.mxu0 %v4277_v25  ;;  %v644_v28 = vshll.u32 %v5092_v6, 16  ;;  %v624_v20 = vrot.slane %v623_v34, 4 }
  0xd4   : > { %v632_v26 = vrot.slane %v630_v4, 4  ;;  %v638_v53 = vrot.slane %v636_v57, 5  ;;  %v643_v47 = vrot.slane %v641_v29, 4  ;;  %v650_v3 = vshll.u32 %v5113_v62, 16  ;;  %v5152_v57 = vld [vmem:[%s4808_s26 + $0x78] sm:$0xf] }
  0xd5   : > { %v5136_v13 = vsel %vm4860_vm3, %v614_v12, %v618_v39  ;;  %v5140_v0 = vsel %vm4995_vm6, %v1203_v32, %v1204_v55  ;;  %v646_v60 = vrot.slane %v644_v28, 5  ;;  %v5145_v40 = vsel %vm4860_vm3, %v624_v20, %v628_v49  ;;  %v4284_v20 = vld [vmem:[#allocation7 + $0xd8] sm:$0xff]  }
  0xd6   : > { %5939 = vst [vmem:[#allocation29_spill] sm:$0xff] %v5136_v13  ;;  %v3425_v4 = vcombine.low %v5131_v35, %v5140_v0  ;;  %3863 = vmatpush3.bf16.msra.mxu0 %v4277_v25  ;;  %v633_v39 = vor.u32 %v632_v26, %v628_v49  ;;  %v5156_v29 = vcombine.low %v5136_v13, %v5145_v40  ;;  %v652_v32 = vrot.slane %v650_v3, 5 }
  0xd7   : > { %v647_v12 = vor.u32 %v646_v60, %v643_v47  ;;  %v1206_v28 = vrot.slane %v1204_v55, 4  ;;  %3864 = vmatprep.subr.bf16.mxu0 %v4280_v51  ;;  %v1207_v34 = vrot.slane %v4926_v50, 5  ;;  %v3333_v56 = vrot.slane %v4934_v54, 9 }
  0xd8   : > { %5940 = vst [vmem:[#allocation30_spill] sm:$0xff] %v5156_v29  ;;  %v634_v61 = vrot.slane %v633_v39, 4  ;;  %v1211_v26 = vrot.slane %v4942_v1, 5  ;;  %3693 = vmatmul.mubr.msk.bf16.gmra.mrb[16].mxu1 %vm743_vm2, %v5156_v29  ;;  %v654_v47 = vshrl.u32 %v5113_v62, 16  ;;  %v660_v49 = vshll.u32 %v5152_v57, 16  ;;  %v5183_v39 = vld [vmem:[#allocation7 + $0xe0] sm:$0xff]  }
  0xd9   : > { %3841 = vmatmul.mubr.msk.bf16.gmra.mrb[4].mxu0 %vm743_vm2, %v3425_v4  ;;  %v648_v25 = vrot.slane %v647_v12, 4  ;;  %v664_v55 = vshrl.u32 %v5152_v57, 16  ;;  %v5176_v50 = vsel %vm4995_vm6, %v1206_v28, %v1207_v34  ;;  %v670_v4 = vshll.u32 %v5159_v48, 16 }
  0xda   : > { %v5172_v60 = vsel %vm4860_vm3, %v634_v61, %v638_v53  ;;  %v5180_v3 = vsel %vm4995_vm6, %v3333_v56, %v1211_v26  ;;  %3865 = vmatpush3.bf16.msra.mxu0 %v4280_v51  ;;  %v656_v53 = vrot.slane %v654_v47, 4  ;;  %v662_v13 = vrot.slane %v660_v49, 5 }
  0xdb   : > { %v5187_v12 = vsel %vm4860_vm3, %v648_v25, %v652_v32  ;;  %v3426_v61 = vcombine.low %v5176_v50, %v5180_v3  ;;  %3866 = vmatprep.subr.bf16.mxu0 %v4284_v20  ;;  %v666_v56 = vrot.slane %v664_v55, 4  ;;  %v672_v28 = vrot.slane %v670_v4, 5 }
  0xdc   : > { %5941 = vst [vmem:[#allocation31_spill] sm:$0xff] %v5187_v12  ;;  %v5193_v34 = vcombine.low %v5172_v60, %v5187_v12  ;;  %v1213_v29 = vrot.slane %v1211_v26, 4  ;;  %v657_v51 = vor.u32 %v656_v53, %v652_v32  ;;  %v1214_v21 = vrot.slane %v4948_v11, 5 }
  0xdd   : > { %3844 = vmatprep.mubr.msk.bf16.mxu0 %vm743_vm2, %v3426_v61  ;;  %v1217_v25 = vrot.slane %v4958_v31, 5  ;;  %v3334_v22 = vrot.slane %v4973_v58, 9  ;;  %v667_v47 = vor.u32 %v666_v56, %v662_v13  ;;  %v1221_v49 = vrot.slane %v4980_v63, 5 }
  0xde   : > { %5942 = vst [vmem:[#allocation32_spill] sm:$0xff] %v5193_v34  ;;  %3696 = vmatprep.mubr.msk.bf16.mxu1 %vm743_vm2, %v5193_v34  ;;  %v1224_v12 = vrot.slane %v5022_v41, 5  ;;  %v1227_v55 = vrot.slane %v5025_v42, 5  ;;  %3867 = vmatpush3.bf16.msra.mxu0 %v4284_v20  ;;  %v658_v26 = vrot.slane %v657_v51, 4  ;;  %v5206_v32 = vsel %vm4995_vm6, %v1213_v29, %v1214_v21 }
  0xdf   : > { %v1216_v4 = vrot.slane %v1214_v21, 4  ;;  %v3335_v31 = vrot.slane %v5061_v24, 9  ;;  %3892 = vmatprep.subr.bf16.mxu0 %v5183_v39  ;;  %v668_v61 = vrot.slane %v667_v47, 4  ;;  %v5212_v53 = vsel %vm4995_vm6, %v3334_v22, %v1221_v49 }
  0xe0   : > { %v1223_v56 = vrot.slane %v1221_v49, 4  ;;  %v1226_v34 = vrot.slane %v1224_v12, 4  ;;  %v5216_v42 = vsel %vm4860_vm3, %v658_v26, %v662_v13  ;;  %v1231_v21 = vrot.slane %v5067_v18, 5 }
  0xe1   : > { %v1218_v29 = vsel %vm4995_vm6, %v1216_v4, %v1217_v25  ;;  %v5223_v20 = vsel %vm4860_vm3, %v668_v61, %v672_v28  ;;  %v3301_v22 = vcombine.low %v4827_v7, %v4830_v8  ;;  %v1234_v8 = vrot.slane %v5078_v27, 5 }
  0xe2   : > { %5943 = vst [vmem:[#allocation33_spill] sm:$0xff] %v5223_v20  ;;  %v3427_v51 = vcombine.low %v5206_v32, %v1218_v29  ;;  %v1225_v47 = vsel %vm4995_vm6, %v1223_v56, %v1224_v12  ;;  %v5232_v13 = vcombine.low %v5216_v42, %v5223_v20  ;;  %v1233_v49 = vrot.slane %v1231_v21, 4 }
  0xe3   : > { %v3428_v25 = vcombine.low %v5212_v53, %v1225_v47  ;;  %v1228_v28 = vsel %vm4995_vm6, %v1226_v34, %v1227_v55  ;;  %v1232_v7 = vsel %vm4995_vm6, %v3335_v31, %v1231_v21  ;;  %v1237_v12 = vrot.slane %v5089_v5, 5  ;;  %v5250_v55 = vld [vmem:[%s4816_s4] sm:$0xf]  ;;  %v5253_v31 = vld [vmem:[%s4816_s4 + $0x4] sm:$0xf] }
  0xe4   : > { %5944 = vst [vmem:[#allocation34_spill] sm:$0xff] %v5232_v13  ;;  %3845 = vmatmul.mubr.msk.bf16.gmra.mrb[8].mxu0 %vm743_vm2, %v3427_v51  ;;  %3697 = vmatmul.mubr.msk.bf16.gmra.mrb[20].mxu1 %vm743_vm2, %v5232_v13  ;;  %v1241_v26 = vrot.slane %v5113_v62, 5  ;;  %v1235_v4 = vsel %vm4995_vm6, %v1233_v49, %v1234_v8  ;;  %v1236_v34 = vrot.slane %v1234_v8, 4  ;;  %v3302_v5 = vcombine.low %v4833_v9, %v4840_v15  ;;  %v4283_v62 = vld [vmem:[#allocation7 + $0x48] sm:$0xff]  }
  0xe5   : > { %3848 = vmatprep.mubr.msk.bf16.mxu0 %vm743_vm2, %v3428_v25  ;;  %3708 = vmatprep.mubr.msk.bf16.mxu1 %vm743_vm2, %v3301_v22  ;;  %v3429_v61 = vcombine.low %v1228_v28, %v1232_v7  ;;  %v1244_v56 = vrot.slane %v5152_v57, 5  ;;  %v3336_v51 = vrot.slane %v5092_v6, 9  ;;  %v1247_v25 = vrot.slane %v5159_v48, 5 }
  0xe6   : > { %v1238_v21 = vsel %vm4995_vm6, %v1236_v34, %v1237_v12  ;;  %v1243_v22 = vrot.slane %v1241_v26, 4  ;;  %v3421_v20 = vrot.slane %v5250_v55, 9  ;;  %v2021_v13 = vrot.slane %v5253_v31, 5  ;;  %v5275_v34 = vld [vmem:[%s4816_s4 + $0xc] sm:$0x1] }
  0xe7   : > { %v3430_v49 = vcombine.low %v1235_v4, %v1238_v21  ;;  %v1246_v8 = vrot.slane %v1244_v56, 4  ;;  %v3303_v15 = vcombine.low %v4848_v23, %v4854_v30  ;;  %v1242_v12 = vsel %vm4995_vm6, %v3336_v51, %v1241_v26  ;;  %5945 = vst [vmem:[#allocation35_spill] sm:$0xff] %v5275_v34 }
  0xe8   : > { %v1245_v48 = vsel %vm4995_vm6, %v1243_v22, %v1244_v56  ;;  %v5283_v30 = vsel %vm4995_vm6, %v3421_v20, %v2021_v13  ;;  %v3339_v26 = vcombine.low %v5033_v52, %v5046_v59  ;;  %v5296_v56 = vcombine.low %v5098_v10, %v5131_v35  ;;  %v4289_v22 = vld [vmem:[#allocation7 + $0x50] sm:$0xff]   ;;  %v5442_v59 = vld [vmem:[#allocation7 + $0x80] sm:$0xff]  }
  0xe9   : > { %v1248_v23 = vsel %vm4995_vm6, %v1246_v8, %v1247_v25  ;;  %v3304_v20 = vcombine.low %v4868_v36, %v4876_v43  ;;  %v2027_v51 = vrot.slane %v5275_v34, 5  ;;  %v3431_v25 = vcombine.low %v1242_v12, %v1245_v48 }
  0xea   : > { %v5304_v8 = vcombine.low %v5140_v0, %v5176_v50  ;;  %v5311_v10 = vcombine.low %v1218_v29, %v5212_v53  ;;  %v5313_v36 = vcombine.low %v1225_v47, %v1228_v28  ;;  %v3305_v43 = vcombine.low %v4894_v2, %v4905_v16  ;;  %v4293_v50 = vld [vmem:[#allocation7 + $0x58] sm:$0xff]   ;;  %v5335_v16 = vld [vmem:[#allocation7 + $0x60] sm:$0xff]   ;;  %v4294_v28 = vld [vmem:[#allocation7 + $0xe8] sm:$0xff]  }
  0xeb   : > { %v5317_v35 = vcombine.low %v1232_v7, %v1235_v4  ;;  %v5321_v0 = vcombine.low %v1245_v48, %v1248_v23  ;;  %v3307_v53 = vcombine.low %v4934_v54, %v4942_v1  ;;  %v5946_v1 = vld [vmem:[#allocation31_spill] sm:$0xff]  ;;  %v3309_v47 = vcombine.low %v4980_v63, %v5022_v41  ;;  %v5367_v4 = vld [vmem:[%s4816_s4 + $0x14] sm:$0xf] }
  0xec   : > { %3849 = vmatmul.mubr.msk.bf16.gmra.mrb[12].mxu0 %vm743_vm2, %v3429_v61  ;;  %3709 = vmatmul.mubr.msk.bf16.vlgmr.msra.gmra.mrb[0].mxu1 %vm743_vm2, %v3302_v5  ;;  %v2024_v61 = vrot.slane %v5267_v33, 5  ;;  %v5292_v5 = vcombine.low %v5058_v14, %v5075_v45  ;;  %v5308_v45 = vcombine.low %v5180_v3, %v5206_v32  ;;  %v3306_v32 = vcombine.low %v4916_v38, %v4921_v44 }
  0xed   : > { %3852 = vmatprep.mubr.msk.bf16.mxu0 %vm743_vm2, %v3430_v49  ;;  %3733 = vmatpush3.bf16.msra.mxu1 %v4964_v46  ;;  %v3432_v46 = vcombine.low %v1248_v23, %v5283_v30  ;;  %v2023_v49 = vrot.slane %v2021_v13, 4  ;;  %v5319_v13 = vcombine.low %v1238_v21, %v1242_v12  ;;  %v3308_v44 = vcombine.low %v4948_v11, %v4973_v58  ;;  %v5364_v11 = vld [vmem:[%s4816_s4 + $0x10] sm:$0xf]  ;;  %v5370_v21 = vld [vmem:[%s4816_s4 + $0x18] sm:$0xf] }
  0xee   : > { %3712 = vmatprep.mubr.msk.bf16.mxu1 %vm743_vm2, %v3303_v15  ;;  %3734 = vmatprep.subr.bf16.mxu1 %v4283_v62  ;;  %v2026_v14 = vrot.slane %v2024_v61, 4  ;;  %v4298_v15 = vld [vmem:[#allocation7 + $0xf0] sm:$0xff]   ;;  %v3488_v12 = vrot.slane %v5364_v11, 9  ;;  %v2708_v48 = vrot.slane %v5367_v4, 5  ;;  %v2711_v23 = vrot.slane %v5370_v21, 5 }
  0xef   : > { %v3452_v52 = vcombine.low %v5367_v4, %v5370_v21  ;;  %vm2980_vm7 = vcmask 1046528  }
  0xf0   : > { %v5332_v2 = vsel %vm4995_vm6, %v2026_v14, %v2027_v51  ;;  %v5383_v51 = vsel %vm4995_vm6, %v3488_v12, %v2708_v48 }
  0xf1   : > { %3735 = vmatpush3.bf16.msra.mxu1 %v4283_v62  ;;  %v5328_v62 = vsel %vm4995_vm6, %v2023_v49, %v2024_v61  ;;  %v3310_v49 = vcombine.low %v5061_v24, %v5067_v18 }
  0xf2   : > { %3736 = vmatprep.subr.bf16.mxu1 %v4289_v22  ;;  %v3433_v3 = vcombine.low %v5328_v62, %v5332_v2 }
  0xf4   : > { %3853 = vmatmul.mubr.msk.bf16.gmra.mrb[16].mxu0 %vm743_vm2, %v3431_v25  ;;  %3713 = vmatmul.mubr.msk.bf16.gmra.mrb[4].mxu1 %vm743_vm2, %v3304_v20  ;;  %v2713_v25 = vrot.slane %v2711_v23, 4 }
  0xf5   : > { %3856 = vmatprep.mubr.msk.bf16.mxu0 %vm743_vm2, %v3432_v46  ;;  %3716 = vmatprep.mubr.msk.bf16.mxu1 %vm743_vm2, %v3305_v43 }
  0xf6   : > { %3737 = vmatpush3.bf16.msra.mxu1 %v4289_v22  ;;  %v2710_v22 = vrot.slane %v2708_v48, 4 }
  0xf7   : > { %3738 = vmatprep.subr.bf16.mxu1 %v4293_v50 }
  0xfa   : > { %3739 = vmatpush3.bf16.msra.mxu1 %v4293_v50  ;;  %v5394_v50 = vsel %vm4995_vm6, %v2710_v22, %v2711_v23  ;;  %v5947_v22 = vrot.slane %v4833_v9, 5  ;;  %v4300_v9 = vld [vmem:[#allocation7 + $0x68] sm:$0xff]  }
  0xfb   : > { %3764 = vmatprep.subr.bf16.mxu1 %v5335_v16 }
  0xfc   : > { %3857 = vmatmul.mubr.msk.bf16.gmra.mrb[20].mxu0 %vm743_vm2, %v3433_v3  ;;  %3717 = vmatmul.mubr.msk.bf16.gmra.mrb[8].mxu1 %vm743_vm2, %v3306_v32 }
  0xfd   : > { %3868 = vmatprep.mubr.msk.bf16.mxu0 %vm743_vm2, %v3304_v20  ;;  %3720 = vmatprep.mubr.msk.bf16.mxu1 %vm743_vm2, %v3307_v53  ;;  %v5379_v20 = vld [vmem:[%s4816_s4 + $0x1c] sm:$0x1] }
  0xfe   : > { %v2714_v46 = vrot.slane %v5379_v20, 5 }
 0x100   : > { %v5398_v3 = vsel %vm4995_vm6, %v2713_v25, %v2714_v46  ;;  %v4305_v46 = vld [vmem:[#allocation7 + $0x100] sm:$0xff]  }
 0x104   : > { %3869 = vmatmul.mubr.msk.bf16.vlgmr.msra.gmra.mrb[0].mxu0 %vm743_vm2, %v3305_v43  ;;  %3721 = vmatmul.mubr.msk.bf16.gmra.mrb[12].mxu1 %vm743_vm2, %v3308_v44  ;;  %v3311_v43 = vcombine.low %v5078_v27, %v5092_v6 }
 0x105   : > { %3893 = vmatpush3.bf16.msra.mxu0 %v5183_v39  ;;  %3724 = vmatprep.mubr.msk.bf16.mxu1 %vm743_vm2, %v3309_v47  ;;  %v4321_v39 = vld [vmem:[%s4808_s26 + $0x4] sm:$0xf] }
 0x106   : > { %3872 = vmatprep.mubr.msk.bf16.mxu0 %vm743_vm2, %v3306_v32  ;;  %3894 = vmatprep.subr.bf16.mxu0 %v4294_v28  ;;  %v1171_v61 = vrot.slane %v4321_v39, 5  ;;  %v4322_v32 = vld [vmem:[%s4808_s26] sm:$0xf]  ;;  %v4301_v39 = vld [vmem:[#allocation7 + $0xf8] sm:$0xff]  }
 0x107   : > { %v3329_v12 = vrot.slane %v4322_v32, 9  ;;  %v5948_v32 = vld [vmem:[#allocation27_spill] sm:$0xff] }
 0x108   : > { %v1173_v48 = vrot.slane %v1171_v61, 4 }
 0x109   : > { %3895 = vmatpush3.bf16.msra.mxu0 %v4294_v28  ;;  %v1172_v23 = vsel %vm4995_vm6, %v3329_v12, %v1171_v61  ;;  %v3450_v61 = vcombine.low %v5250_v55, %v5253_v31  ;;  %v5953_v12 = vld [vmem:[#allocation20_spill] sm:$0xff] }
 0x10a   : > { %3896 = vmatprep.subr.bf16.mxu0 %v4298_v15  ;;  %v1175_v25 = vsel %vm4995_vm6, %v1173_v48, %v5947_v22  ;;  %v5954_v48 = vld [vmem:[#allocation21_spill] sm:$0xff]  ;;  %v1748_v22 = vshrl.u32 %v5250_v55, 16 }
 0x10b   : > { %v3337_v28 = vcombine.low %v1172_v23, %v1175_v25  ;;  %v5955_v23 = vld [vmem:[#allocation24_spill] sm:$0xff]  ;;  %v1751_v25 = vshll.u32 %v5250_v55, 16 }
 0x10c   : > { %3873 = vmatmul.mubr.msk.bf16.gmra.mrb[4].mxu0 %vm743_vm2, %v3307_v53  ;;  %3725 = vmatmul.mubr.msk.bf16.gmra.mrb[16].mxu1 %vm743_vm2, %v3310_v49  ;;  %v3312_v53 = vcombine.low %v5948_v32, %v5152_v57 }
 0x10d   : > { %3876 = vmatprep.mubr.msk.bf16.mxu0 %vm743_vm2, %v3308_v44  ;;  %3728 = vmatprep.mubr.msk.bf16.mxu1 %vm743_vm2, %v3311_v43  ;;  %v5950_v44 = vld [vmem:[#allocation23_spill] sm:$0xff] }
 0x10e   : > { %3897 = vmatpush3.bf16.msra.mxu0 %v4298_v15  ;;  %v5951_v15 = vcombine.low %v5949_v17, %v5950_v44  ;;  %v2471_v17 = vshrl.u32 %v5364_v11, 16  ;;  %v2474_v44 = vshll.u32 %v5364_v11, 16 }
 0x10f   : > { %3898 = vmatprep.subr.bf16.mxu0 %v4301_v39 }
 0x112   : > { %3899 = vmatpush3.bf16.msra.mxu0 %v4301_v39  ;;  %v4310_v39 = vld [vmem:[#allocation7 + $0x110] sm:$0xff]  }
 0x113   : > { %3924 = vmatprep.subr.bf16.mxu0 %v4305_v46 }
 0x114   : > { %3877 = vmatmul.mubr.msk.bf16.gmra.mrb[8].mxu0 %vm743_vm2, %v3309_v47  ;;  %3729 = vmatmul.mubr.msk.bf16.gmra.mrb[20].mxu1 %vm743_vm2, %v3312_v53  ;;  %v4304_v47 = vld [vmem:[#allocation7 + $0x70] sm:$0xff]  }
 0x115   : > { %3880 = vmatprep.mubr.msk.bf16.mxu0 %vm743_vm2, %v3310_v49  ;;  %3740 = vmatprep.mubr.msk.bf16.mxu1 %vm743_vm2, %v3337_v28  ;;  %v3451_v49 = vcombine.low %v5267_v33, %v5364_v11  ;;  %v4313_v28 = vld [vmem:[#allocation7 + $0x118] sm:$0xff]  }
 0x11c   : > { %3881 = vmatmul.mubr.msk.bf16.gmra.mrb[12].mxu0 %vm743_vm2, %v3311_v43  ;;  %3741 = vmatmul.mubr.msk.bf16.vlgmr.msra.gmra.mrb[0].mxu1 %vm743_vm2, %v5951_v15  ;;  %v4306_v43 = vld [vmem:[#allocation7 + $0x78] sm:$0xff]   ;;  %v1771_v15 = vshrl.u32 %v5267_v33, 16 }
 0x11d   : > { %3884 = vmatprep.mubr.msk.bf16.mxu0 %vm743_vm2, %v3312_v53  ;;  %3765 = vmatpush3.bf16.msra.mxu1 %v5335_v16  ;;  %v4307_v16 = vld [vmem:[#allocation7 + $0x108] sm:$0xff]   ;;  %v1757_v53 = vshll.u32 %v5253_v31, 16 }
 0x11e   : > { %3744 = vmatprep.mubr.msk.bf16.mxu1 %vm743_vm2, %v3339_v26  ;;  %3766 = vmatprep.subr.bf16.mxu1 %v4300_v9  ;;  %v5952_v26 = vld [vmem:[#allocation19_spill] sm:$0xff] }
 0x121   : > { %3767 = vmatpush3.bf16.msra.mxu1 %v4300_v9  ;;  %v1761_v9 = vshrl.u32 %v5253_v31, 16 }
 0x122   : > { %3768 = vmatprep.subr.bf16.mxu1 %v4304_v47 }
 0x124   : > { %3885 = vmatmul.mubr.msk.bf16.gmra.mrb[16].mxu0 %vm743_vm2, %v3450_v61  ;;  %3745 = vmatmul.mubr.msk.bf16.gmra.mrb[4].mxu1 %vm743_vm2, %v5292_v5  ;;  %v1753_v61 = vrot.slane %v1751_v25, 5 }
 0x125   : > { %3888 = vmatprep.mubr.msk.bf16.mxu0 %vm743_vm2, %v3451_v49  ;;  %3748 = vmatprep.mubr.msk.bf16.mxu1 %vm743_vm2, %v5296_v56  ;;  %v1767_v49 = vshll.u32 %v5267_v33, 16 }
 0x126   : > { %3769 = vmatpush3.bf16.msra.mxu1 %v4304_v47  ;;  %v1750_v47 = vrot.slane %v1748_v22, 4  ;;  %v5957_v22 = vld [vmem:[#allocation28_spill] sm:$0xff] }
 0x127   : > { %3770 = vmatprep.subr.bf16.mxu1 %v4306_v43 }
 0x128   : > { %v1754_v25 = vor.u32 %v1753_v61, %v1750_v47  ;;  %v1777_v47 = vshll.u32 %v5275_v34, 16  ;;  %v5959_v34 = vld [vmem:[#allocation32_spill] sm:$0xff] }
 0x12a   : > { %3771 = vmatpush3.bf16.msra.mxu1 %v4306_v43  ;;  %v1759_v43 = vrot.slane %v1757_v53, 5  ;;  %v2494_v53 = vshrl.u32 %v5370_v21, 16 }
 0x12b   : > { %3956 = vmatprep.subr.bf16.mxu1 %v5442_v59 }
 0x12c   : > { %3889 = vmatmul.mubr.msk.bf16.gmra.mrb[20].mxu0 %vm743_vm2, %v3452_v52  ;;  %3749 = vmatmul.mubr.msk.bf16.gmra.mrb[8].mxu1 %vm743_vm2, %v5304_v8  ;;  %v1763_v52 = vrot.slane %v1761_v9, 4  ;;  %v5958_v9 = vld [vmem:[#allocation30_spill] sm:$0xff]  ;;  %v2496_v54 = vrot.slane %v2494_v53, 4 }
 0x12d   : > { %3900 = vmatprep.mubr.msk.bf16.mxu0 %vm743_vm2, %v5952_v26  ;;  %3752 = vmatprep.mubr.msk.bf16.mxu1 %vm743_vm2, %v5308_v45  ;;  %v5477_v26 = vld [vmem:[%s4808_s26 + $0x10] sm:$0xf]  ;;  %v5961_v53 = vld [vmem:[#allocation34_spill] sm:$0xff] }
 0x134   : > { %3901 = vmatmul.mubr.msk.bf16.vlgmr.msra.gmra.mrb[0].mxu0 %vm743_vm2, %v5953_v12  ;;  %3753 = vmatmul.mubr.msk.bf16.gmra.mrb[12].mxu1 %vm743_vm2, %v5311_v10  ;;  %v1773_v12 = vrot.slane %v1771_v15, 4 }
 0x135   : > { %3925 = vmatpush3.bf16.msra.mxu0 %v4305_v46  ;;  %3756 = vmatprep.mubr.msk.bf16.mxu1 %vm743_vm2, %v5313_v36  ;;  %v5956_v46 = vld [vmem:[#allocation25_spill] sm:$0xff] }
 0x136   : > { %3904 = vmatprep.mubr.msk.bf16.mxu0 %vm743_vm2, %v5954_v48  ;;  %3926 = vmatprep.subr.bf16.mxu0 %v4307_v16  ;;  %v2473_v48 = vrot.slane %v2471_v17, 4  ;;  %v2480_v17 = vshll.u32 %v5367_v4, 16 }
 0x139   : > { %3927 = vmatpush3.bf16.msra.mxu0 %v4307_v16  ;;  %v5480_v16 = vld [vmem:[%s4808_s26 + $0x14] sm:$0xf] }
 0x13a   : > { %3928 = vmatprep.subr.bf16.mxu0 %v4310_v39  ;;  %v3365_v11 = vcombine.low %v5477_v26, %v5480_v16 }
 0x13c   : > { %3905 = vmatmul.mubr.msk.bf16.gmra.mrb[4].mxu0 %vm743_vm2, %v5955_v23  ;;  %3757 = vmatmul.mubr.msk.bf16.gmra.mrb[16].mxu1 %vm743_vm2, %v5317_v35  ;;  %v2484_v23 = vshrl.u32 %v5367_v4, 16  ;;  %v2482_v4 = vrot.slane %v2480_v17, 5 }
 0x13d   : > { %3908 = vmatprep.mubr.msk.bf16.mxu0 %vm743_vm2, %v5956_v46  ;;  %3760 = vmatprep.mubr.msk.bf16.mxu1 %vm743_vm2, %v5319_v13  ;;  %v1769_v46 = vrot.slane %v1767_v49, 5  ;;  %v5497_v49 = vld [vmem:[%s4808_s26 + $0x18] sm:$0xf] }
 0x13e   : > { %3929 = vmatpush3.bf16.msra.mxu0 %v4310_v39  ;;  %v2476_v39 = vrot.slane %v2474_v44, 5  ;;  %v2490_v44 = vshll.u32 %v5370_v21, 16  ;;  %v2486_v14 = vrot.slane %v2484_v23, 4  ;;  %v5505_v21 = vld [vmem:[%s4808_s26 + $0x24] sm:$0xf]  ;;  %v3373_v23 = vcombine.low %v5067_v18, %v5078_v27  ;;  %v5964_v27 = vld [vmem:[#allocation29_spill] sm:$0xff] }
 0x13f   : > { %3930 = vmatprep.subr.bf16.mxu0 %v4313_v28  ;;  %v1774_v15 = vor.u32 %v1773_v12, %v1769_v46  ;;  %v5963_v18 = vld [vmem:[#allocation26_spill] sm:$0xff] }
 0x140   : > { %v2477_v61 = vor.u32 %v2476_v39, %v2473_v48  ;;  %v2492_v7 = vrot.slane %v2490_v44, 5  ;;  %v1779_v39 = vrot.slane %v1777_v47, 5  ;;  %v2487_v17 = vor.u32 %v2486_v14, %v2482_v4  ;;  %v4330_v47 = vld [vmem:[#allocation7 + $0x88] sm:$0xff]  }
 0x141   : > { %v1775_v48 = vrot.slane %v1774_v15, 4  ;;  %v2500_v15 = vshll.u32 %v5379_v20, 16 }
 0x142   : > { %3931 = vmatpush3.bf16.msra.mxu0 %v4313_v28  ;;  %v1764_v28 = vor.u32 %v1763_v52, %v1759_v43  ;;  %v1755_v52 = vrot.slane %v1754_v25, 4  ;;  %v2478_v38 = vrot.slane %v2477_v61, 4  ;;  %v2497_v44 = vor.u32 %v2496_v54, %v2492_v7  ;;  %v5538_v54 = vld [vmem:[%s4808_s26 + $0x34] sm:$0xf] }
 0x144   : > { %3909 = vmatmul.mubr.msk.bf16.gmra.mrb[8].mxu0 %vm743_vm2, %v5957_v22  ;;  %3761 = vmatmul.mubr.msk.bf16.gmra.mrb[20].mxu1 %vm743_vm2, %v5321_v0  ;;  %v5500_v22 = vld [vmem:[%s4808_s26 + $0x20] sm:$0xf]  ;;  %v1765_v29 = vrot.slane %v1764_v28, 4  ;;  %v5516_v25 = vsel %vm4860_vm3, %v1755_v52, %v1759_v43  ;;  %v2483_v43 = vsel %vm4860_vm3, %v2478_v38, %v2482_v4  ;;  %v2498_v61 = vrot.slane %v2497_v44, 4  ;;  %v5546_v38 = vld [vmem:[%s4808_s26 + $0x38] sm:$0xf] }
 0x145   : > { %3912 = vmatprep.mubr.msk.bf16.mxu0 %vm743_vm2, %v5958_v9  ;;  %3772 = vmatprep.mubr.msk.bf16.mxu1 %vm743_vm2, %v3365_v11  ;;  %v3366_v9 = vcombine.low %v5497_v49, %v5500_v22  ;;  %v5508_v11 = vld [vmem:[%s4808_s26 + $0x28] sm:$0xf]  ;;  %v5549_v52 = vld [vmem:[%s4808_s26 + $0x40] sm:$0xf]  ;;  %v5562_v44 = vld [vmem:[%s4808_s26 + $0x44] sm:$0xf] }
 0x146   : > { %v3367_v12 = vcombine.low %v5505_v21, %v5508_v11  ;;  %v5523_v28 = vsel %vm4860_vm3, %v1765_v29, %v1769_v46  ;;  %v5535_v29 = vld [vmem:[%s4808_s26 + $0x30] sm:$0xf]  ;;  %v2488_v46 = vrot.slane %v2487_v17, 4  ;;  %v3369_v4 = vcombine.low %v5546_v38, %v5549_v52 }
 0x147   : > { %v3368_v20 = vcombine.low %v5535_v29, %v5538_v54  ;;  %v3469_v14 = vcombine.low %v5516_v25, %v5523_v28 }
 0x14c   : > { %3913 = vmatmul.mubr.msk.bf16.gmra.mrb[12].mxu0 %vm743_vm2, %v5959_v34  ;;  %3773 = vmatmul.mubr.msk.bf16.vlgmr.msra.gmra.mrb[0].mxu1 %vm743_vm2, %v3366_v9  ;;  %v5530_v34 = vsel %vm4860_vm3, %v1775_v48, %v1779_v39  ;;  %v2502_v9 = vrot.slane %v2500_v15, 5  ;;  %v2493_v48 = vsel %vm4860_vm3, %v2488_v46, %v2492_v7  ;;  %v5565_v15 = vld [vmem:[%s4808_s26 + $0x48] sm:$0xf]  ;;  %v3372_v7 = vcombine.low %v5022_v41, %v5061_v24 }
 0x14d   : > { %3916 = vmatprep.mubr.msk.bf16.mxu0 %vm743_vm2, %v5961_v53  ;;  %3960 = vmatpush3.bf16.msra.mxu1 %v5442_v59  ;;  %v3470_v59 = vcombine.low %v5530_v34, %v2483_v43  ;;  %v4336_v53 = vld [vmem:[#allocation7 + $0x98] sm:$0xff]   ;;  %v3370_v43 = vcombine.low %v5562_v44, %v5565_v15  ;;  %v3376_v41 = vcombine.low %v5253_v31, %v5267_v33 }
 0x14e   : > { %3776 = vmatprep.mubr.msk.bf16.mxu1 %vm743_vm2, %v3367_v12  ;;  %3957 = vmatprep.subr.bf16.mxu1 %v4330_v47  ;;  %v4335_v12 = vld [vmem:[#allocation7 + $0x90] sm:$0xff]   ;;  %v2503_v39 = vsel %vm4860_vm3, %v2498_v61, %v2502_v9  ;;  %v5962_v24 = vcombine.low %v5071_v37, %v5103_v19  ;;  %v5967_v37 = vld [vmem:[#allocation33_spill] sm:$0xff] }
 0x14f   : > { %v3471_v17 = vcombine.low %v2493_v48, %v2503_v39  ;;  %v3403_v19 = vcombine.low %v5967_v37, %v5516_v25 }
 0x151   : > { %3961 = vmatpush3.bf16.msra.mxu1 %v4330_v47  ;;  %v3371_v47 = vcombine.low %v4973_v58, %v4980_v63  ;;  %v3374_v58 = vcombine.low %v5092_v6, %v5948_v32  ;;  %v3375_v63 = vcombine.low %v5152_v57, %v5250_v55  ;;  %v5965_v6 = vcombine.low %v5963_v18, %v5964_v27  ;;  %v4340_v18 = vld [vmem:[%s4808_s26 + $0x2c] sm:$0x1] }
 0x152   : > { %3958 = vmatprep.subr.bf16.mxu1 %v4335_v12  ;;  %v5966_v57 = vcombine.low %v5145_v40, %v5172_v60  ;;  %v3404_v40 = vcombine.low %v5523_v28, %v5530_v34  ;;  %v5971_v60 = vcombine.low %v5394_v50, %v5398_v3  ;;  %v359_v3 = vunpack.c.l.bf16 %v5477_v26  ;;  %v5665_v26 = vld [vmem:[%s5865_s3] ss:$0 sm:$0xff] }
 0x153   : > { %v360_v32 = vunpack.c.l.bf16 %v5480_v16  ;;  %v363_v34 = vunpack.c.l.bf16 %v5500_v22  ;;  %v366_v27 = vunpack.c.l.bf16 %v4340_v18 }
 0x154   : > { %3917 = vmatmul.mubr.msk.bf16.gmra.mrb[16].mxu0 %vm743_vm2, %v3469_v14  ;;  %3777 = vmatmul.mubr.msk.bf16.gmra.mrb[4].mxu1 %vm743_vm2, %v3368_v20  ;;  %v364_v20 = vunpack.c.l.bf16 %v5505_v21 }
 0x155   : > { %3920 = vmatprep.mubr.msk.bf16.mxu0 %vm743_vm2, %v3470_v59  ;;  %3780 = vmatprep.mubr.msk.bf16.mxu1 %vm743_vm2, %v3369_v4  ;;  %v2982_v46 = vrot.slane %v360_v32, 1  ;;  %v2988_v16 = vrot.slane %v363_v34, 1  ;;  %v4342_v34 = vld [vmem:[%s4808_s26 + $0x4c] sm:$0x1] }
 0x156   : > { %3962 = vmatpush3.bf16.msra.mxu1 %v4335_v12  ;;  %v2989_v9 = vrot.slane %v364_v20, 1  ;;  %v374_v20 = vunpack.c.l.bf16 %v4342_v34 }
 0x157   : > { %3959 = vmatprep.subr.bf16.mxu1 %v4336_v53 }
 0x15a   : > { %3963 = vmatpush3.bf16.msra.mxu1 %v4336_v53  ;;  %v367_v53 = vunpack.c.l.bf16 %v5535_v29 }
 0x15c   : > { %3921 = vmatmul.mubr.msk.bf16.gmra.mrb[20].mxu0 %vm743_vm2, %v3471_v17  ;;  %3781 = vmatmul.mubr.msk.bf16.gmra.mrb[8].mxu1 %vm743_vm2, %v3370_v43  ;;  %v368_v17 = vunpack.c.l.bf16 %v5538_v54 }
 0x15d   : > { %3932 = vmatprep.mubr.msk.bf16.mxu0 %vm743_vm2, %v5292_v5  ;;  %3784 = vmatprep.mubr.msk.bf16.mxu1 %vm743_vm2, %v3371_v47  ;;  %v5968_v5 = vcombine.low %v5283_v30, %v5328_v62 }
 0x164   : > { %3933 = vmatmul.mubr.msk.bf16.vlgmr.msra.gmra.mrb[0].mxu0 %vm743_vm2, %v5296_v56  ;;  %3785 = vmatmul.mubr.msk.bf16.gmra.mrb[12].mxu1 %vm743_vm2, %v3372_v7  ;;  %v5969_v56 = vcombine.low %v5946_v1, %v5216_v42  ;;  %v4339_v1 = vld [vmem:[%s4808_s26 + $0x1c] sm:$0x1] }
 0x165   : > { %3936 = vmatprep.mubr.msk.bf16.mxu0 %vm743_vm2, %v5304_v8  ;;  %3788 = vmatprep.mubr.msk.bf16.mxu1 %vm743_vm2, %v3373_v23  ;;  %v5970_v8 = vcombine.low %v5332_v2, %v5383_v51  ;;  %v361_v2 = vunpack.c.l.bf16 %v5497_v49  ;;  %v362_v51 = vunpack.c.l.bf16 %v4339_v1  ;;  %v2981_v49 = vrot.slane %v359_v3, 1 }
 0x166   : > { %v365_v23 = vunpack.c.l.bf16 %v5508_v11  ;;  %v2996_v11 = vrot.slane %v368_v17, 1 }
 0x167   : > { %v2984_v14 = vrot.slane %v361_v2, 1  ;;  %v2986_v59 = vrot.slane %v362_v51, 1  ;;  %v2983_v48 = vsel %vm2980_vm7, %v2981_v49, %v2982_v46  ;;  %v4341_v2 = vld [vmem:[%s4808_s26 + $0x3c] sm:$0x1] }
 0x168   : > { %v370_v1 = vunpack.c.l.bf16 %v4341_v2 }
 0x169   : > { %v2987_v22 = vsel %vm2980_vm7, %v2984_v14, %v2986_v59  ;;  %v2985_v54 = vsel %vm2980_vm7, %v2982_v46, %v2984_v14  ;;  %v371_v14 = vunpack.c.l.bf16 %v5549_v52 }
 0x16c   : > { %3937 = vmatmul.mubr.msk.bf16.gmra.mrb[4].mxu0 %vm743_vm2, %v5308_v45  ;;  %3789 = vmatmul.mubr.msk.bf16.gmra.mrb[16].mxu1 %vm743_vm2, %v3374_v58  ;;  %v369_v58 = vunpack.c.l.bf16 %v5546_v38 }
 0x16d   : > { %3940 = vmatprep.mubr.msk.bf16.mxu0 %vm743_vm2, %v5311_v10  ;;  %3792 = vmatprep.mubr.msk.bf16.mxu1 %vm743_vm2, %v3375_v63 }
 0x174   : > { %3941 = vmatmul.mubr.msk.bf16.gmra.mrb[8].mxu0 %vm743_vm2, %v5313_v36  ;;  %3793 = vmatmul.mubr.msk.bf16.gmra.mrb[20].mxu1 %vm743_vm2, %v3376_v41  ;;  %v2990_v41 = vsel %vm2980_vm7, %v2988_v16, %v2989_v9 }
 0x175   : > { %3944 = vmatprep.mubr.msk.bf16.mxu0 %vm743_vm2, %v5317_v35  ;;  %3816 = vmatprep.mubr.msk.bf16.mxu1 %vm743_vm2, %v5962_v24 }
 0x17c   : > { %3945 = vmatmul.mubr.msk.bf16.gmra.mrb[12].mxu0 %vm743_vm2, %v5319_v13  ;;  %3817 = vmatmul.mubr.msk.bf16.vlgmr.msra.gmra.mrb[12].mxu1 %vm743_vm2, %v5965_v6 }
 0x17d   : > { %3948 = vmatprep.mubr.msk.bf16.mxu0 %vm743_vm2, %v5321_v0  ;;  %3820 = vmatprep.mubr.msk.bf16.mxu1 %vm743_vm2, %v5966_v57 }
 0x184   : > { %3949 = vmatmul.mubr.msk.bf16.gmra.mrb[16].mxu0 %vm743_vm2, %v5968_v5  ;;  %3821 = vmatmul.mubr.msk.bf16.gmra.mrb[16].mxu1 %vm743_vm2, %v5969_v56  ;;  %v2991_v5 = vrot.slane %v365_v23, 1  ;;  %v2998_v56 = vrot.slane %v369_v58, 1 }
 0x185   : > { %3952 = vmatprep.mubr.msk.bf16.mxu0 %vm743_vm2, %v5970_v8  ;;  %3824 = vmatprep.mubr.msk.bf16.mxu1 %vm743_vm2, %v3403_v19  ;;  %v2995_v19 = vrot.slane %v367_v53, 1 }
 0x186   : > { %v2999_v59 = vsel %vm2980_vm7, %v2996_v11, %v2998_v56 }
 0x187   : > { %v2997_v51 = vsel %vm2980_vm7, %v2995_v19, %v2996_v11  ;;  %v4346_v11 = vld [vmem:[%s4808_s26 + $0x54] sm:$0xf] }
 0x18c   : > { %3953 = vmatmul.mubr.msk.bf16.gmra.mrb[20].mxu0 %vm743_vm2, %v5971_v60  ;;  %3825 = vmatmul.mubr.msk.bf16.gmra.mrb[20].mxu1 %vm743_vm2, %v3404_v40  ;;  %v2993_v60 = vrot.slane %v366_v27, 1  ;;  %v4343_v27 = vld [vmem:[%s4808_s26 + $0x58] sm:$0xf] }
 0x21f   : > { %v3774_v42 = vpop.f32.mrb[0].mxu1 }
 0x220   : > { %v1628_v30 = vpop.f32.mrb[1].mxu1 }
 0x221   : > { %v3775_v45 = vpop.f32.mrb[2].mxu1 }
 0x222   : > { %v1631_v10 = vpop.f32.mrb[3].mxu1 }
 0x227   : > { %v3778_v36 = vpop.f32.mrb[4].mxu1 }
 0x228   : > { %v5641_v35 = vpop.f32.mrb[5].mxu1 }
 0x229   : > { %v5643_v13 = vpop.f32.mrb[6].mxu1 }
 0x22a   : > { %v5645_v0 = vpop.f32.mrb[7].mxu1 }
 0x22f   : > { %v5647_v62 = vpop.f32.mrb[8].mxu1 }
 0x230   : > { %v5651_v50 = vpop.f32.mrb[9].mxu1 }
 0x231   : > { %v5655_v25 = vpop.f32.mrb[10].mxu1 }
 0x232   : > { %v5657_v28 = vpop.f32.mrb[11].mxu1 }
 0x237   : > { %v3934_v61 = vpop.f32.mrb[0].mxu0 }
 0x238   : > { %v3964_v4 = vadd.f32 %v3934_v61, %v3774_v42  ;;  %v2798_v12 = vpop.f32.mrb[1].mxu0  ;;  %v372_v42 = vunpack.c.l.bf16 %v5562_v44  ;;  %v2994_v61 = vsel %vm2980_vm7, %v2991_v5, %v2993_v60 }
 0x239   : > { %v3965_v21 = vadd.f32 %v2798_v12, %v1628_v30  ;;  %v3935_v39 = vpop.f32.mrb[2].mxu0 }
 0x23a   : > { %v2926_v43 = vadd.f32 %v3964_v4, %v5665_v26  ;;  %v3966_v47 = vadd.f32 %v3935_v39, %v3775_v45  ;;  %v2801_v7 = vpop.f32.mrb[3].mxu0  ;;  %v3003_v16 = vrot.slane %v372_v42, 1 }
 0x23b   : > { %v2924_v63 = vadd.f32 %v3965_v21, %v5665_v26  ;;  %v3967_v24 = vadd.f32 %v2801_v7, %v1631_v10  ;;  %v373_v10 = vunpack.c.l.bf16 %v5565_v15  ;;  %v3007_v21 = vrot.slane %v374_v20, 1 }
 0x23c   : > { %v3063_v6 = vadd.f32 %v2987_v22, %v2926_v43  ;;  %v2927_v29 = vadd.f32 %v3966_v47, %v5665_v26  ;;  %v3000_v22 = vrot.slane %v370_v1, 1 }
 0x23d   : > { %v3061_v57 = vadd.f32 %v2983_v48, %v2924_v63  ;;  %v2925_v37 = vadd.f32 %v3967_v24, %v5665_v26  ;;  %v3002_v48 = vrot.slane %v371_v14, 1 }
 0x23e   : > { %3087 = vst.msk [vmem:[%s5680_s7 + $0x10] sm:$0xff] %vm743_vm2, %v3063_v6  ;;  %v3064_v38 = vadd.f32 %v2990_v41, %v2927_v29  ;;  %v3001_v23 = vsel %vm2980_vm7, %v2998_v56, %v3000_v22  ;;  %v377_v6 = vunpack.c.l.bf16 %v4343_v27  ;;  %v4344_v29 = vld [vmem:[%s4808_s26 + $0x5c] sm:$0x1] }
 0x23f   : > { %3085 = vst.msk [vmem:[%s5680_s7] sm:$0xff] %vm743_vm2, %v3061_v57  ;;  %v3062_v8 = vadd.f32 %v2985_v54, %v2925_v37  ;;  %v3938_v40 = vpop.f32.mrb[4].mxu0  ;;  %v3004_v41 = vsel %vm2980_vm7, %v3002_v48, %v3003_v16  ;;  %v4345_v37 = vld [vmem:[%s4808_s26 + $0x50] sm:$0xf] }
 0x240   : > { %3088 = vst.msk [vmem:[%s5680_s7 + $0x18] sm:$0xff] %vm743_vm2, %v3064_v38  ;;  %v3968_v30 = vadd.f32 %v3938_v40, %v3778_v36  ;;  %v2814_v45 = vpop.f32.mrb[5].mxu0  ;;  %v2992_v36 = vsel %vm2980_vm7, %v2989_v9, %v2991_v5  ;;  %v3005_v9 = vrot.slane %v373_v10, 1  ;;  %v375_v19 = vunpack.c.l.bf16 %v4345_v37  ;;  %v4348_v40 = vld [vmem:[%s4808_s26 + $0x64] sm:$0xf] }
 0x241   : > { %3086 = vst.msk [vmem:[%s5680_s7 + $0x8] sm:$0xff] %vm743_vm2, %v3062_v8  ;;  %v3969_v3 = vadd.f32 %v2814_v45, %v5641_v35  ;;  %v3939_v32 = vpop.f32.mrb[6].mxu0  ;;  %v376_v38 = vunpack.c.l.bf16 %v4346_v11  ;;  %v380_v60 = vunpack.c.l.bf16 %v4348_v40  ;;  %v3012_v45 = vrot.slane %v377_v6, 1 }
 0x242   : > { %v2930_v44 = vadd.f32 %v3968_v30, %v5665_v26  ;;  %v3970_v15 = vadd.f32 %v3939_v32, %v5643_v13  ;;  %v2817_v49 = vpop.f32.mrb[7].mxu0  ;;  %v3006_v43 = vsel %vm2980_vm7, %v3003_v16, %v3005_v9  ;;  %v3008_v63 = vsel %vm2980_vm7, %v3005_v9, %v3007_v21  ;;  %v4351_v21 = vld [vmem:[%s4808_s26 + $0x68] sm:$0xf] }
 0x243   : > { %v2928_v46 = vadd.f32 %v3969_v3, %v5665_v26  ;;  %v3971_v35 = vadd.f32 %v2817_v49, %v5645_v0  ;;  %v3010_v3 = vrot.slane %v376_v38, 1  ;;  %v3017_v14 = vrot.slane %v380_v60, 1 }
 0x244   : > { %v3067_v52 = vadd.f32 %v2997_v51, %v2930_v44  ;;  %v2931_v4 = vadd.f32 %v3970_v15, %v5665_v26  ;;  %v3009_v51 = vrot.slane %v375_v19, 1  ;;  %v381_v48 = vunpack.c.l.bf16 %v4351_v21 }
 0x245   : > { %v3065_v12 = vadd.f32 %v2992_v36, %v2928_v46  ;;  %v2929_v13 = vadd.f32 %v3971_v35, %v5665_v26  ;;  %v388_v60 = vunpack.c.l.bf16 %v5253_v31 }
 0x246   : > { %3091 = vst.msk [vmem:[%s5680_s7 + $0x30] sm:$0xff] %vm743_vm2, %v3067_v52  ;;  %v3068_v39 = vadd.f32 %v2999_v59, %v2931_v4  ;;  %v4350_v52 = vld [vmem:[%s4808_s26 + $0x74] sm:$0xf]  ;;  %v3011_v22 = vsel %vm2980_vm7, %v3009_v51, %v3010_v3 }
 0x247   : > { %3089 = vst.msk [vmem:[%s5680_s7 + $0x20] sm:$0xff] %vm743_vm2, %v3065_v12  ;;  %v3066_v0 = vadd.f32 %v2994_v61, %v2929_v13  ;;  %v3942_v53 = vpop.f32.mrb[8].mxu0  ;;  %v4349_v61 = vld [vmem:[%s4808_s26 + $0x70] sm:$0xf]  ;;  %v384_v4 = vunpack.c.l.bf16 %v4350_v52 }
 0x248   : > { %3092 = vst.msk [vmem:[%s5680_s7 + $0x38] sm:$0xff] %vm743_vm2, %v3068_v39  ;;  %v3972_v17 = vadd.f32 %v3942_v53, %v5647_v62  ;;  %v2830_v47 = vpop.f32.mrb[9].mxu0  ;;  %v383_v16 = vunpack.c.l.bf16 %v4349_v61 }
 0x249   : > { %3090 = vst.msk [vmem:[%s5680_s7 + $0x28] sm:$0xff] %vm743_vm2, %v3066_v0  ;;  %v3973_v7 = vadd.f32 %v2830_v47, %v5651_v50  ;;  %v3943_v58 = vpop.f32.mrb[10].mxu0  ;;  %v378_v50 = vunpack.c.l.bf16 %v4344_v29  ;;  %v3019_v29 = vrot.slane %v381_v48, 1 }
 0x24a   : > { %v2934_v24 = vadd.f32 %v3972_v17, %v5665_v26  ;;  %v3974_v62 = vadd.f32 %v3943_v58, %v5655_v25  ;;  %v2833_v18 = vpop.f32.mrb[11].mxu0  ;;  %v4347_v25 = vld [vmem:[%s4808_s26 + $0x60] sm:$0xf]  ;;  %v4352_v17 = vld [vmem:[%s4808_s26 + $0x78] sm:$0xf] }
 0x24b   : > { %v2932_v54 = vadd.f32 %v3973_v7, %v5665_v26  ;;  %v3975_v57 = vadd.f32 %v2833_v18, %v5657_v28  ;;  %v379_v8 = vunpack.c.l.bf16 %v4347_v25  ;;  %v3014_v10 = vrot.slane %v378_v50, 1  ;;  %v4353_v58 = vld [vmem:[%s4808_s26 + $0x6c] sm:$0x1] }
 0x24c   : > { %v3071_v5 = vadd.f32 %v3006_v43, %v2934_v24  ;;  %v2935_v56 = vadd.f32 %v3974_v62, %v5665_v26  ;;  %v385_v43 = vunpack.c.l.bf16 %v4352_v17  ;;  %v3023_v62 = vrot.slane %v383_v16, 1 }
 0x24d   : > { %v3069_v42 = vadd.f32 %v3001_v23, %v2932_v54  ;;  %v2933_v30 = vadd.f32 %v3975_v57, %v5665_v26  ;;  %v3016_v20 = vrot.slane %v379_v8, 1  ;;  %v3015_v59 = vsel %vm2980_vm7, %v3012_v45, %v3014_v10 }
 0x24e   : > { %3095 = vst.msk [vmem:[%s5680_s7 + $0x50] sm:$0xff] %vm743_vm2, %v3071_v5  ;;  %v3072_v28 = vadd.f32 %v3008_v63, %v2935_v56  ;;  %v3013_v23 = vsel %vm2980_vm7, %v3010_v3, %v3012_v45  ;;  %v382_v63 = vunpack.c.l.bf16 %v4353_v58  ;;  %v3024_v18 = vrot.slane %v384_v4, 1 }
 0x24f   : > { %3093 = vst.msk [vmem:[%s5680_s7 + $0x40] sm:$0xff] %vm743_vm2, %v3069_v42  ;;  %v3070_v2 = vadd.f32 %v3004_v41, %v2933_v30  ;;  %v3946_v1 = vpop.f32.mrb[12].mxu0  ;;  %v3818_v32 = vpop.f32.mrb[12].mxu1  ;;  %v3018_v0 = vsel %vm2980_vm7, %v3016_v20, %v3017_v14  ;;  %v3026_v37 = vrot.slane %v385_v43, 1  ;;  %v389_v42 = vunpack.c.l.bf16 %v5267_v33 }
 0x250   : > { %3096 = vst.msk [vmem:[%s5680_s7 + $0x58] sm:$0xff] %vm743_vm2, %v3072_v28  ;;  %v2846_v34 = vpop.f32.mrb[13].mxu0  ;;  %v3976_v44 = vadd.f32 %v3946_v1, %v3818_v32  ;;  %v1947_v36 = vpop.f32.mrb[13].mxu1  ;;  %v3021_v5 = vrot.slane %v382_v63, 1  ;;  %v3025_v56 = vsel %vm2980_vm7, %v3023_v62, %v3024_v18  ;;  %v3020_v28 = vsel %vm2980_vm7, %v3017_v14, %v3019_v29 }
 0x251   : > { %3094 = vst.msk [vmem:[%s5680_s7 + $0x48] sm:$0xff] %vm743_vm2, %v3070_v2  ;;  %v3947_v15 = vpop.f32.mrb[14].mxu0  ;;  %v3977_v49 = vadd.f32 %v2846_v34, %v1947_v36  ;;  %v3819_v46 = vpop.f32.mrb[14].mxu1  ;;  %v4354_v2 = vld [vmem:[%s4808_s26 + $0x7c] sm:$0x1]  ;;  %v3027_v3 = vsel %vm2980_vm7, %v3024_v18, %v3026_v37  ;;  %v5972_v34 = vld [vmem:[#allocation35_spill] sm:$0xff]  ;;  %v387_v14 = vunpack.c.l.bf16 %v5250_v55 }
 0x252   : > { %v2849_v35 = vpop.f32.mrb[15].mxu0  ;;  %v2938_v9 = vadd.f32 %v3976_v44, %v5665_v26  ;;  %v3978_v12 = vadd.f32 %v3947_v15, %v3819_v46  ;;  %v1950_v13 = vpop.f32.mrb[15].mxu1  ;;  %v386_v1 = vunpack.c.l.bf16 %v4354_v2  ;;  %v390_v20 = vunpack.c.l.bf16 %v5972_v34  ;;  %s4446_s26 = scalar_lea.vmem %s4445_s25, 6144 }
 0x253   : > { %v2936_v39 = vadd.f32 %v3977_v49, %v5665_v26  ;;  %v3979_v53 = vadd.f32 %v2849_v35, %v1950_v13  ;;  %v3022_v44 = vsel %vm2980_vm7, %v3019_v29, %v3021_v5  ;;  %v3033_v49 = vrot.slane %v389_v42, 1  ;;  %p4448_p1 = scmp.lt.s32.totalorder %s4446_s26, %s4440_s13 }
 0x254   : > { %v3075_v47 = vadd.f32 %v3015_v59, %v2938_v9  ;;  %v2939_v7 = vadd.f32 %v3978_v12, %v5665_v26  ;;  %v3031_v59 = vrot.slane %v388_v60, 1  ;;  %v3028_v61 = vrot.slane %v386_v1, 1 }
 0x255   : > { %v3073_v41 = vadd.f32 %v3011_v22, %v2936_v39  ;;  %v2937_v24 = vadd.f32 %v3979_v53, %v5665_v26  ;;  %v3035_v9 = vrot.slane %v390_v20, 1  ;;  %v3030_v13 = vrot.slane %v387_v14, 1  ;;  %p4449_p3 = por %p4448_p1, %p4447_p2 }
 0x256   : > { %3099 = vst.msk [vmem:[%s5680_s7 + $0x70] sm:$0xff] %vm743_vm2, %v3075_v47  ;;  %v3076_v27 = vadd.f32 %v3018_v0, %v2939_v7  ;;  %v3034_v21 = vsel %vm2980_vm7, %v3031_v59, %v3033_v49  ;;  %v3029_v17 = vsel %vm2980_vm7, %v3026_v37, %v3028_v61 }
 0x257   : > { %v3950_v6 = vpop.f32.mrb[16].mxu0  ;;  %3097 = vst.msk [vmem:[%s5680_s7 + $0x60] sm:$0xff] %vm743_vm2, %v3073_v41  ;;  %v3074_v50 = vadd.f32 %v3013_v23, %v2937_v24  ;;  %v3822_v54 = vpop.f32.mrb[16].mxu1  ;;  %v3036_v23 = vsel %vm2980_vm7, %v3033_v49, %v3035_v9  ;;  %v3032_v24 = vsel %vm2980_vm7, %v3030_v13, %v3031_v59  ;;  %p4450_p4 = pnand %p4449_p3, %p4443_p6 }
 0x258   : > { %v2862_v57 = vpop.f32.mrb[17].mxu0  ;;  %3100 = vst.msk [vmem:[%s5680_s7 + $0x78] sm:$0xff] %vm743_vm2, %v3076_v27  ;;  %v3980_v19 = vadd.f32 %v3950_v6, %v3822_v54  ;;  %v1963_v11 = vpop.f32.mrb[17].mxu1 }
 0x259   : > { %v3951_v38 = vpop.f32.mrb[18].mxu0  ;;  %3098 = vst.msk [vmem:[%s5680_s7 + $0x68] sm:$0xff] %vm743_vm2, %v3074_v50  ;;  %v3981_v25 = vadd.f32 %v2862_v57, %v1963_v11  ;;  %v3823_v8 = vpop.f32.mrb[18].mxu1 }
 0x25a   : > { %v2865_v40 = vpop.f32.mrb[19].mxu0  ;;  %v2942_v30 = vadd.f32 %v3980_v19, %v5665_v26  ;;  %v3982_v45 = vadd.f32 %v3951_v38, %v3823_v8  ;;  %v1966_v10 = vpop.f32.mrb[19].mxu1 }
 0x25b   : > { %v2940_v51 = vadd.f32 %v3981_v25, %v5665_v26  ;;  %v3983_v32 = vadd.f32 %v2865_v40, %v1966_v10 }
 0x25c   : > { %v3079_v31 = vadd.f32 %v3025_v56, %v2942_v30  ;;  %v2943_v33 = vadd.f32 %v3982_v45, %v5665_v26 }
 0x25d   : > { %v3077_v36 = vadd.f32 %v3020_v28, %v2940_v51  ;;  %v2941_v15 = vadd.f32 %v3983_v32, %v5665_v26 }
 0x25e   : > { %3103 = vst.msk [vmem:[%s5680_s7 + $0x90] sm:$0xff] %vm743_vm2, %v3079_v31  ;;  %v3080_v46 = vadd.f32 %v3027_v3, %v2943_v33 }
 0x25f   : > { %v3954_v35 = vpop.f32.mrb[20].mxu0  ;;  %3101 = vst.msk [vmem:[%s5680_s7 + $0x80] sm:$0xff] %vm743_vm2, %v3077_v36  ;;  %v3078_v16 = vadd.f32 %v3022_v44, %v2941_v15  ;;  %v3826_v52 = vpop.f32.mrb[20].mxu1 }
 0x260   : > { %v2878_v4 = vpop.f32.mrb[21].mxu0  ;;  %3104 = vst.msk [vmem:[%s5680_s7 + $0x98] sm:$0xff] %vm743_vm2, %v3080_v46  ;;  %v3984_v55 = vadd.f32 %v3954_v35, %v3826_v52  ;;  %v1979_v22 = vpop.f32.mrb[21].mxu1 }
 0x261   : > { %v3955_v12 = vpop.f32.mrb[22].mxu0  ;;  %3102 = vst.msk [vmem:[%s5680_s7 + $0x88] sm:$0xff] %vm743_vm2, %v3078_v16  ;;  %v3985_v48 = vadd.f32 %v2878_v4, %v1979_v22  ;;  %v3827_v39 = vpop.f32.mrb[22].mxu1 }
 0x262   : > { %v2881_v0 = vpop.f32.mrb[23].mxu0  ;;  %v2946_v53 = vadd.f32 %v3984_v55, %v5665_v26  ;;  %v3986_v43 = vadd.f32 %v3955_v12, %v3827_v39  ;;  %v1982_v47 = vpop.f32.mrb[23].mxu1 }
 0x263   : > { %v2944_v7 = vadd.f32 %v3985_v48, %v5665_v26  ;;  %v3987_v58 = vadd.f32 %v2881_v0, %v1982_v47 }
 0x264   : > { %v3083_v63 = vadd.f32 %v3034_v21, %v2946_v53  ;;  %v2947_v41 = vadd.f32 %v3986_v43, %v5665_v26 }
 0x265   : > { %v3081_v62 = vadd.f32 %v3029_v17, %v2944_v7  ;;  %v2945_v18 = vadd.f32 %v3987_v58, %v5665_v26 }
 0x266   : > { %3107 = vst.msk [vmem:[%s5680_s7 + $0xb0] sm:$0xff] %vm743_vm2, %v3083_v63  ;;  %v3084_v27 = vadd.f32 %v3036_v23, %v2947_v41 }
 0x267   : > { %3105 = vst.msk [vmem:[%s5680_s7 + $0xa0] sm:$0xff] %vm743_vm2, %v3081_v62  ;;  %v3082_v6 = vadd.f32 %v3032_v24, %v2945_v18 }
 0x268   : > { %3108 = vst.msk [vmem:[%s5680_s7 + $0xb8] sm:$0xff] %vm743_vm2, %v3084_v27 }
 0x269   : > { %3106 = vst.msk [vmem:[%s5680_s7 + $0xa8] sm:$0xff] %vm743_vm2, %v3082_v6 }
 0x26a   : > { %4453 = shalt.err (!%p4450_p4)
}
 0x26b   : > { %s4454_s0 = scalar_lea.hbm %s5797_s15, 3072  ;;  %s4458_s30 = scalar_lea.hbm %s5973_s8, 9216 }
 0x26c   : > { %p4455_p11 = scmp.ne.s32.totalorder %s5797_s15, %s4454_s0  ;;  %p4459_p12 = scmp.lt.u32.totalorder %s5797_s15, %s5973_s8 }
 0x26d   : > { %p4460_p0 = scmp.lt.u32.totalorder %s4458_s30, %s4454_s0  ;;  %p4462_p9 = scmp.lt.u32.totalorder %s4454_s0, %s5797_s15 }
 0x26e   : > { %p4456_p5 = pnand %p4455_p11, %p5974_p10 }
 0x26f   : > { %p4461_p8 = por %p4460_p0, %p4459_p12 }
 0x270   : > { %p4457_p13 = pneg %p4456_p5 }
 0x271   : > { %p4463_p7 = por %p4462_p9, %p4461_p8 }
 0x273   : > { %p4464_p6 = pnand %p4463_p7, %p4457_p13 }
 0x275   : > { %4467 = shalt.err (!%p4464_p6)
}
 0x276   : > { %s4568_s5 = smov 128   ;;  %s4569_s14 = smov 8  }
 0x277   : > { %4165 = dma.vmem_to_hbm [thread:$0]  (%p5974_p10), %s5799_s28, 3072, %s5797_s15, %s3110_s18, %s4568_s5, %s4568_s5, %s4569_s14  }
 0x278 PF: > { %s5975_s7 = sld [smem:[#allocation13_spill]]  ;;  %s5976_s9 = sld [smem:[#allocation17_spill]] }
 0x279   : > { %p4177_p2 = scmp.ge.s32.totalorder %s4556_s23, 2 }
 0x27e   : > { %s3141_s21 = sand.u32 1, %s5975_s7   ;;  %p5977_p1 = scmp.ne.s32.totalorder %s5976_s9, 0 }
 0x27f   : > { %s3142_s11 = scalar_lea.sflag [#allocation4], %s3141_s21 }
 0x280   : > { %p4172_p3 = pnand %p4177_p2, %p5977_p1 }
 0x282   : > { %4517 = dma.done.wait (!%p4172_p3), %s3142_s11, 3072  }
 0x283   : > { %4519 = vsyncadd (!%p4172_p3), %s3142_s11, 4294964224  ;;  %s23_s23 = sadd.s32 1, %s4556_s23   ;;  %s5978_s13 = sld [smem:[#allocation16_spill]] }
 0x284   : > { %p20_p4 = scmp.ge.s32.totalorder %s23_s23, 5   ;;  %s5979_s27 = sld [smem:[#allocation15_spill]] }
 0x285   : > { %s5980_s10 = sld [smem:[#allocation14_spill]]  ;;  %s5981_s15 = smov %s4528_s16 }
 0x286   : > { %s5982_s16 = smov %s4532_s17  ;;  %s5984_s18 = smov %s4540_s19 }
 0x287   : > { %s5985_s19 = smov %s4544_s20  ;;  %s5987_s21 = smov %s4552_s22 }
 0x288   :  { %22 = sbr.rel (!%p20_p4) target bundleno = 13 (0xd), region = 106 }
 0x289   : > { %s5983_s17 = smov %s5978_s13 }
 0x28a   : > { %s5986_s20 = smov %s5979_s27 }
 0x28b   : > { %s5988_s22 = smov %s5980_s10 }
 0x28f   :  { %3147 = vsyncpa [#allocation3], 1 }
 0x290   :  { %3149 = vsyncpa [#allocation3 + $0x1], 1 }
 0x291   :  { %3150 = vsyncpa [#allocation6], 1 }
 0x292   :  { %3152 = vsyncpa [#allocation6 + $0x1], 1 }
 0x293   :  { %3153 = vsyncpa [#allocation4], 1 }
 0x294   :  { %3155 = vsyncpa [#allocation4 + $0x1], 1 }

</bundles_post_ra>
